<compile_context>
chip_gen: v7x
topology: tpu7x:2x2x1
jax: 0.10.0
libtpu: 0.0.40
codegen_flags: <defaults>
</compile_context>

<pallas_src>
import jax
import jax.numpy as jnp
from jax.experimental import pallas as pl
from jax.experimental.pallas import tpu as pltpu

EPS = 1e-6

TILE_M = 512            # rows (B*S)
TILE_N = 512            # output features
TILE_H = 512            # FFN hidden reduction tile (backbone)
REWARD_TILE_H = 2048    # FFN hidden reduction tile (reward path, tiny B)

_VMEM_LIMIT_CACHE = None


def _vmem_limit_bytes():
    """Per-generation VMEM budget: ~40 MiB on 64 MiB parts, ~96 MiB on 128 MiB."""
    global _VMEM_LIMIT_CACHE
    if _VMEM_LIMIT_CACHE is None:
        try:
            cap = pltpu.get_tpu_info().vmem_capacity_bytes
        except Exception:
            cap = 128 * 1024 * 1024
        _VMEM_LIMIT_CACHE = (40 if cap <= 64 * 1024 * 1024 else 96) * 1024 * 1024
    return _VMEM_LIMIT_CACHE


def _round_up(x, m):
    return ((x + m - 1) // m) * m


def _tile(dim, target):
    """Largest tile <= target that divides dim (falls back to the full dim)."""
    if dim <= target:
        return dim
    t = target
    while t > 0 and dim % t:
        t //= 2
    return t if (t > 0 and dim % t == 0) else dim


def _row_tiling(M):
    """Row-tile size + padded row count (rows are padded, never shrunk)."""
    tm = min(TILE_M, _round_up(M, 8))
    rows = _round_up(M, tm)
    # v7x megacore: give the "parallel" row axis at least 2 blocks when possible.
    if rows // tm == 1 and tm >= 16 and tm % 16 == 0:
        tm //= 2
    return tm, rows


def _pad_rows(x, rows):
    M = x.shape[0]
    if rows == M:
        return x
    return jnp.pad(x, ((0, rows - M), (0, 0)))


# ----------------------------------------------------------------------------
# Fused RMSNorm + Linear (no bias)  — attn_norm + fused QKV projection
#   grid = (rows, out-features); norm result cached in bf16 scratch at j == 0.
# ----------------------------------------------------------------------------
def _rmsnorm_linear_kernel(x_ref, nw_ref, w_ref, o_ref, xn_ref):
    @pl.when(pl.program_id(1) == 0)
    def _():
        x = x_ref[...].astype(jnp.float32)                       # (tm, D)
        inv = jax.lax.rsqrt(jnp.mean(x * x, axis=-1, keepdims=True) + EPS)
        xn_ref[...] = (x * inv * nw_ref[...]).astype(xn_ref.dtype)

    o_ref[...] = jnp.dot(xn_ref[...], w_ref[...],
                         preferred_element_type=jnp.float32).astype(o_ref.dtype)


def rmsnorm_linear(x, norm_w, w):
    # x: (M, D) bf16, norm_w: (D,) f32, w: (D, N) bf16 -> (M, N) bf16
    M, D = x.shape
    N = w.shape[1]
    tm, rows = _row_tiling(M)
    tn = _tile(N, TILE_N)
    xp = _pad_rows(x, rows)
    # TODO(synk): add a K(=D) reduction grid axis for very large D; RMSNorm
    # statistics need the full row, so that also requires a two-pass scheme.
    out = pl.pallas_call(
        _rmsnorm_linear_kernel,
        out_shape=jax.ShapeDtypeStruct((rows, N), jnp.bfloat16),
        grid=(rows // tm, N // tn),
        in_specs=[pl.BlockSpec((tm, D), lambda i, j: (i, 0)),
                  pl.BlockSpec((1, D), lambda i, j: (0, 0)),
                  pl.BlockSpec((D, tn), lambda i, j: (0, j))],
        out_specs=pl.BlockSpec((tm, tn), lambda i, j: (i, j)),
        scratch_shapes=[pltpu.VMEM((tm, D), jnp.bfloat16)],       # cached norm
        compiler_params=pltpu.CompilerParams(
            dimension_semantics=("parallel", "arbitrary"),
            vmem_limit_bytes=_vmem_limit_bytes()),
    )(xp, norm_w.reshape(1, D), w)
    return out[:M]


# ----------------------------------------------------------------------------
# Plain tiled Linear (no bias)  — attention output projection
# ----------------------------------------------------------------------------
def _linear_kernel(x_ref, w_ref, o_ref):
    o_ref[...] = jnp.dot(x_ref[...].astype(w_ref.dtype), w_ref[...],
                         preferred_element_type=jnp.float32).astype(o_ref.dtype)


def linear(x, w):
    # x: (M, K) bf16, w: (K, N) bf16 -> (M, N) bf16
    M, K = x.shape
    N = w.shape[1]
    tm, rows = _row_tiling(M)
    tn = _tile(N, TILE_N)
    xp = _pad_rows(x, rows)
    out = pl.pallas_call(
        _linear_kernel,
        out_shape=jax.ShapeDtypeStruct((rows, N), jnp.bfloat16),
        grid=(rows // tm, N // tn),
        in_specs=[pl.BlockSpec((tm, K), lambda i, j: (i, 0)),
                  pl.BlockSpec((K, tn), lambda i, j: (0, j))],
        out_specs=pl.BlockSpec((tm, tn), lambda i, j: (i, j)),
        compiler_params=pltpu.CompilerParams(
            dimension_semantics=("parallel", "parallel"),
            vmem_limit_bytes=_vmem_limit_bytes()),
    )(xp, w)
    return out[:M]


# ----------------------------------------------------------------------------
# Fused ffn_norm + SwiGLU FFN, H-tiled with an f32 accumulator (backbone)
#   norm result cached in bf16 scratch at h == 0, reused for every H tile.
# ----------------------------------------------------------------------------
def _ffn_kernel(x_ref, nw_ref, w1_ref, w3_ref, w2_ref, o_ref, xn_ref, acc_ref):
    h_idx = pl.program_id(1)

    @pl.when(h_idx == 0)
    def _():
        x = x_ref[...].astype(jnp.float32)                       # (tm, D)
        inv = jax.lax.rsqrt(jnp.mean(x * x, axis=-1, keepdims=True) + EPS)
        xn_ref[...] = (x * inv * nw_ref[...]).astype(xn_ref.dtype)
        acc_ref[...] = jnp.zeros_like(acc_ref)

    xn = xn_ref[...]                                             # bf16 MXU operand
    g = jnp.dot(xn, w1_ref[...], preferred_element_type=jnp.float32)   # (tm, th)
    u = jnp.dot(xn, w3_ref[...], preferred_element_type=jnp.float32)
    s = (g * jax.nn.sigmoid(g)) * u                              # SiLU gate, f32
    acc_ref[...] += jnp.dot(s.astype(w2_ref.dtype), w2_ref[...],
                            preferred_element_type=jnp.float32)

    @pl.when(h_idx == pl.num_programs(1) - 1)
    def _():
        o_ref[...] = acc_ref[...].astype(o_ref.dtype)


def ffn(x, norm_w, w1, w3, w2):
    # x: (M, D) bf16, w1/w3: (D, H) bf16, w2: (H, D) bf16 -> (M, D) bf16
    M, D = x.shape
    H = w1.shape[1]
    tm, rows = _row_tiling(M)
    th = _tile(H, TILE_H)
    xp = _pad_rows(x, rows)
    out = pl.pallas_call(
        _ffn_kernel,
        out_shape=jax.ShapeDtypeStruct((rows, D), jnp.bfloat16),
        grid=(rows // tm, H // th),
        in_specs=[pl.BlockSpec((tm, D), lambda i, h: (i, 0)),
                  pl.BlockSpec((1, D), lambda i, h: (0, 0)),
                  pl.BlockSpec((D, th), lambda i, h: (0, h)),
                  pl.BlockSpec((D, th), lambda i, h: (0, h)),
                  pl.BlockSpec((th, D), lambda i, h: (h, 0))],
        out_specs=pl.BlockSpec((tm, D), lambda i, h: (i, 0)),
        scratch_shapes=[pltpu.VMEM((tm, D), jnp.bfloat16),        # cached norm
                        pltpu.VMEM((tm, D), jnp.float32)],        # accumulator
        compiler_params=pltpu.CompilerParams(
            dimension_semantics=("parallel", "arbitrary"),
            vmem_limit_bytes=_vmem_limit_bytes()),
    )(xp, norm_w.reshape(1, D), w1, w3, w2)
    return out[:M]


# ----------------------------------------------------------------------------
# Fused reward path (LAST TOKEN ONLY):
#   ffn_norm -> SwiGLU FFN (H-tiled reduction) -> final RMSNorm -> reward head
# ----------------------------------------------------------------------------
def _reward_path_kernel(x_ref, fnw_ref, w1_ref, w3_ref, w2_ref,
                        nw_ref, rw_ref, rb_ref, out_ref, xn_ref, acc_ref):
    h_idx = pl.program_id(0)

    @pl.when(h_idx == 0)
    def _():
        x = x_ref[...].astype(jnp.float32)                       # (B, D)
        inv = jax.lax.rsqrt(jnp.mean(x * x, axis=-1, keepdims=True) + EPS)
        xn_ref[...] = (x * inv * fnw_ref[...]).astype(xn_ref.dtype)
        acc_ref[...] = jnp.zeros_like(acc_ref)

    xn = xn_ref[...]                                             # bf16 MXU operand
    g = jnp.dot(xn, w1_ref[...], preferred_element_type=jnp.float32)   # (B, th)
    u = jnp.dot(xn, w3_ref[...], preferred_element_type=jnp.float32)
    s = (g * jax.nn.sigmoid(g)) * u
    acc_ref[...] += jnp.dot(s.astype(w2_ref.dtype), w2_ref[...],
                            preferred_element_type=jnp.float32)

    @pl.when(h_idx == pl.num_programs(0) - 1)
    def _():
        y = acc_ref[...]                                         # (B, D) f32
        inv = jax.lax.rsqrt(jnp.mean(y * y, axis=-1, keepdims=True) + EPS)
        hs = y * inv * nw_ref[...]                               # final RMSNorm
        # Reward head: N=1 matmul would waste the MXU and hit masked stores.
        # VPU multiply + lane reduce, written to a lane-dense (B, 128) slab.
        r = jnp.sum(hs * rw_ref[...], axis=-1, keepdims=True) + rb_ref[0]
        out_ref[...] = jnp.broadcast_to(r, out_ref.shape)


def reward_path(last_hidden, ffn_norm_w, w1, w3, w2, norm_w, reward_w, reward_b):
    # last_hidden: (B, D) bf16 -- last token only (all ops are per-token).
    B, D = last_hidden.shape
    H = w1.shape[1]
    th = _tile(H, REWARD_TILE_H)
    n_steps = H // th
    # Pure weight-DMA kernel for tiny B: deepen buffering when there are enough steps.
    wmode = pl.Buffered(3) if n_steps >= 4 else None

    def wspec(shape, imap):
        if wmode is None:
            return pl.BlockSpec(shape, imap)
        return pl.BlockSpec(shape, imap, pipeline_mode=wmode)

    out = pl.pallas_call(
        _reward_path_kernel,
        out_shape=jax.ShapeDtypeStruct((B, 128), jnp.float32),
        grid=(n_steps,),
        in_specs=[
            pl.BlockSpec((B, D), lambda h: (0, 0)),
            pl.BlockSpec((1, D), lambda h: (0, 0)),
            wspec((D, th), lambda h: (0, h)),
            wspec((D, th), lambda h: (0, h)),
            wspec((th, D), lambda h: (h, 0)),
            pl.BlockSpec((1, D), lambda h: (0, 0)),
            pl.BlockSpec((1, D), lambda h: (0, 0)),
            pl.BlockSpec(memory_space=pltpu.MemorySpace.SMEM),   # scalar bias
        ],
        out_specs=pl.BlockSpec((B, 128), lambda h: (0, 0)),
        scratch_shapes=[pltpu.VMEM((B, D), jnp.bfloat16),        # normed input
                        pltpu.VMEM((B, D), jnp.float32)],        # FFN accumulator
        compiler_params=pltpu.CompilerParams(
            dimension_semantics=("arbitrary",),
            vmem_limit_bytes=_vmem_limit_bytes()),
    )(last_hidden, ffn_norm_w.reshape(1, D), w1, w3, w2,
      norm_w.reshape(1, D), reward_w.reshape(1, D), reward_b.reshape(1))
    return out[:, :1]                                            # (B, 1) f32


# ----------------------------------------------------------------------------
# Frozen synthetic llama backbone (inference-only, bf16 residual stream)
# ----------------------------------------------------------------------------
def llama_forward(params, input_ids, attention_mask=None):
    # Returns pre-final-norm hidden states of shape (B, S, D)
    # (what RewardModel.forward treats as "logits").
    x = params["embedding"][input_ids]                           # (B, S, D) bf16
    B, S, D = x.shape

    causal = jnp.tril(jnp.ones((S, S), jnp.float32))[None, :, :]
    mask = causal
    if attention_mask is not None:
        mask = mask * attention_mask.astype(jnp.float32)[:, None, :]

    for layer in params["layers"]:
        flat = x.reshape(B * S, D)
        # attn_norm fused with the concatenated QKV projection (lane-dense N=3D)
        qkv = rmsnorm_linear(flat, layer["attn_norm"], layer["wqkv"])
        q, k, v = jnp.split(qkv.reshape(B, S, 3 * D), 3, axis=-1)
        # TODO(synk): replace with a flash-style Pallas kernel (online softmax
        # over KV tiles) once S grows beyond a few hundred; plain JAX is fine
        # at the toy S=8 used here.
        scores = jnp.einsum("bqd,bkd->bqk", q, k,
                            preferred_element_type=jnp.float32) / (float(D) ** 0.5)
        scores = jnp.where(mask > 0, scores, -1e9)
        probs = jax.nn.softmax(scores, axis=-1)                  # f32 softmax
        ctx = jnp.einsum("bqk,bkd->bqd", probs.astype(v.dtype), v,
                         preferred_element_type=jnp.float32).astype(jnp.bfloat16)
        x = x + linear(ctx.reshape(B * S, D), layer["wo"]).reshape(B, S, D)
        # ffn_norm fused into the SwiGLU FFN kernel
        x = x + ffn(x.reshape(B * S, D), layer["ffn_norm"],
                    layer["w1"], layer["w3"], layer["w2"]).reshape(B, S, D)
    return x


def reward_model_forward(params, input_ids, attention_mask=None):
    # Mirrors RewardModel.forward:
    #   logits = llama(input_ids, attention_mask)
    #   hidden = llama.norm(llama.layers[-1].ffn(llama.layers[-1].ffn_norm(logits)))
    #   reward = reward_head(hidden[:, -1, :])
    # All reward-path ops are per-token, so slicing the last token first is
    # exactly equivalent and S-times cheaper.
    logits = llama_forward(params, input_ids, attention_mask)
    last_tok = logits[:, -1, :]                                  # (B, D) bf16
    last = params["layers"][-1]
    return reward_path(last_tok, last["ffn_norm"], last["w1"], last["w3"],
                       last["w2"], params["norm"],
                       params["reward_w"], params["reward_b"])


# ----------------------------------------------------------------------------
# Deterministic parameter init (synthetic; no checkpoint loading)
# ----------------------------------------------------------------------------
def init_params(key, vocab, dim, hidden, n_layers):
    def normal(k, shape, scale=0.05, dtype=jnp.float32):
        return (scale * jax.random.normal(k, shape, dtype=jnp.float32)).astype(dtype)

    keys = iter(jax.random.split(key, 4 + 8 * n_layers))
    params = {
        "embedding": normal(next(keys), (vocab, dim), dtype=jnp.bfloat16),
        "norm": jnp.ones((dim,), jnp.float32),
        "reward_w": normal(next(keys), (dim,)),      # torch Linear(dim,1) weight
        "reward_b": jnp.zeros((1,), jnp.float32),
        "layers": [],
    }
    for _ in range(n_layers):
        wq = normal(next(keys), (dim, dim), dtype=jnp.bfloat16)
        wk = normal(next(keys), (dim, dim), dtype=jnp.bfloat16)
        wv = normal(next(keys), (dim, dim), dtype=jnp.bfloat16)
        params["layers"].append({
            "attn_norm": jnp.ones((dim,), jnp.float32),
            "wqkv": jnp.concatenate([wq, wk, wv], axis=1),  # fused (D, 3D) bf16
            "wo": normal(next(keys), (dim, dim), dtype=jnp.bfloat16),
            "ffn_norm": jnp.ones((dim,), jnp.float32),
            "w1": normal(next(keys), (dim, hidden), dtype=jnp.bfloat16),
            "w3": normal(next(keys), (dim, hidden), dtype=jnp.bfloat16),
            "w2": normal(next(keys), (hidden, dim), dtype=jnp.bfloat16),
        })
    return params


# TODO(synk): torch.no_grad()/requires_grad=False freezing has no forward-pass
# equivalent; only inference semantics are reproduced here (frozen bf16 weights).

if __name__ == "__main__":
    VOCAB, DIM, HIDDEN, N_LAYERS = 64, 32, 64, 2
    B, S = 2, 8

    key = jax.random.PRNGKey(0)
    pkey, dkey = jax.random.split(key)
    params = init_params(pkey, VOCAB, DIM, HIDDEN, N_LAYERS)

    input_ids = jax.random.randint(dkey, (B, S), 0, VOCAB, dtype=jnp.int32)
    attention_mask = jnp.ones((B, S), dtype=jnp.float32)

    reward = jax.jit(reward_model_forward)(params, input_ids, attention_mask)
    reward = jax.block_until_ready(reward)

    assert reward.shape == (B, 1), reward.shape
    assert bool(jnp.all(jnp.isfinite(reward)))
    print("KERNEL_OK")
</pallas_src>

<mosaic_0001>
module attributes {stable_mosaic.version = 11 : i64} {
  func.func @_rmsnorm_linear_kernel(%arg0: i32, %arg1: i32, %arg2: memref<8x32xbf16, #tpu.memory_space<vmem>>, %arg3: memref<1x32xf32, #tpu.memory_space<vmem>>, %arg4: memref<32x96xbf16, #tpu.memory_space<vmem>>, %arg5: memref<8x96xbf16, #tpu.memory_space<vmem>>, %arg6: memref<8x32xbf16, #tpu.memory_space<vmem>>) attributes {dimension_semantics = [#tpu.dimension_semantics<parallel>, #tpu.dimension_semantics<arbitrary>], iteration_bounds = array<i64: 2, 1>, scalar_prefetch = 0 : i64, scratch_operands = 1 : i64, tpu.core_type = #tpu.core_type<tc>, window_params = [{transform_indices = @transform_0, window_bounds = array<i64: 8, 32>}, {pipeline_mode = #tpu.pipeline_mode<synchronous>, transform_indices = @transform_1, window_bounds = array<i64: 1, 32>}, {transform_indices = @transform_2, window_bounds = array<i64: 32, 96>}, {transform_indices = @transform_3, window_bounds = array<i64: 8, 96>}]} {
    %c0_i32 = arith.constant 0 : i32
    %0 = arith.cmpi eq, %arg1, %c0_i32 : i32
    %1 = arith.extui %0 : i1 to i32
    %c0_i32_0 = arith.constant 0 : i32
    %2 = arith.cmpi ne, %1, %c0_i32_0 : i32
    scf.if %2 {
      %c0_6 = arith.constant 0 : index
      %c0_7 = arith.constant 0 : index
      %8 = vector.load %arg2[%c0_6, %c0_7] : memref<8x32xbf16, #tpu.memory_space<vmem>>, vector<8x32xbf16>
      %9 = arith.extf %8 : vector<8x32xbf16> to vector<8x32xf32>
      %10 = arith.mulf %9, %9 : vector<8x32xf32>
      %cst_8 = arith.constant dense<0.000000e+00> : vector<8xf32>
      %11 = vector.multi_reduction <add>, %10, %cst_8 [1] : vector<8x32xf32> to vector<8xf32>
      %12 = vector.shape_cast %11 : vector<8xf32> to vector<8x1xf32>
      %cst_9 = arith.constant 3.200000e+01 : f32
      %13 = vector.broadcast %cst_9 : f32 to vector<8x1xf32>
      %14 = arith.divf %12, %13 : vector<8x1xf32>
      %cst_10 = arith.constant 9.99999997E-7 : f32
      %15 = vector.broadcast %cst_10 : f32 to vector<8x1xf32>
      %16 = arith.addf %14, %15 : vector<8x1xf32>
      %17 = math.rsqrt %16 : vector<8x1xf32>
      %18 = vector.broadcast %17 : vector<8x1xf32> to vector<8x32xf32>
      %19 = arith.mulf %9, %18 : vector<8x32xf32>
      %c0_11 = arith.constant 0 : index
      %c0_12 = arith.constant 0 : index
      %20 = vector.load %arg3[%c0_11, %c0_12] : memref<1x32xf32, #tpu.memory_space<vmem>>, vector<1x32xf32>
      %21 = vector.broadcast %20 : vector<1x32xf32> to vector<8x32xf32>
      %22 = arith.mulf %19, %21 : vector<8x32xf32>
      %23 = arith.truncf %22 : vector<8x32xf32> to vector<8x32xbf16>
      %c0_13 = arith.constant 0 : index
      %c0_14 = arith.constant 0 : index
      %24 = vector.load %arg6[%c0_13, %c0_14] : memref<8x32xbf16, #tpu.memory_space<vmem>>, vector<8x32xbf16>
      tpu.vector_store %arg6[%c0_13, %c0_14], %23 {strides = array<i32>} : memref<8x32xbf16, #tpu.memory_space<vmem>>, vector<8x32xbf16>,
    } else {
    }
    %c0 = arith.constant 0 : index
    %c0_1 = arith.constant 0 : index
    %3 = vector.load %arg6[%c0, %c0_1] : memref<8x32xbf16, #tpu.memory_space<vmem>>, vector<8x32xbf16>
    %c0_2 = arith.constant 0 : index
    %c0_3 = arith.constant 0 : index
    %4 = vector.load %arg4[%c0_2, %c0_3] : memref<32x96xbf16, #tpu.memory_space<vmem>>, vector<32x96xbf16>
    %cst = arith.constant dense<0.000000e+00> : vector<8x96xf32>
    %5 = tpu.matmul %3, %4, %cst {dimension_numbers = #tpu.dot_dimension_numbers<[1], [0], [0], [1], [0, 0, 1, 1], [], []>} : vector<8x32xbf16>, vector<32x96xbf16>, vector<8x96xf32> -> vector<8x96xf32>
    %6 = arith.truncf %5 : vector<8x96xf32> to vector<8x96xbf16>
    %c0_4 = arith.constant 0 : index
    %c0_5 = arith.constant 0 : index
    %7 = vector.load %arg5[%c0_4, %c0_5] : memref<8x96xbf16, #tpu.memory_space<vmem>>, vector<8x96xbf16>
    tpu.vector_store %arg5[%c0_4, %c0_5], %6 {strides = array<i32>} : memref<8x96xbf16, #tpu.memory_space<vmem>>, vector<8x96xbf16>,
    return
  }
  func.func @transform_0(%arg0: i32, %arg1: i32) -> (i32, i32) {
    %c0_i32 = arith.constant 0 : i32
    %c0_i32_0 = arith.constant 0 : i32
    return %arg0, %c0_i32 : i32, i32
  }
  func.func @transform_1(%arg0: i32, %arg1: i32) -> (i32, i32) {
    %c0_i32 = arith.constant 0 : i32
    %c0_i32_0 = arith.constant 0 : i32
    %c0_i32_1 = arith.constant 0 : i32
    return %c0_i32, %c0_i32_0 : i32, i32
  }
  func.func @transform_2(%arg0: i32, %arg1: i32) -> (i32, i32) {
    %c0_i32 = arith.constant 0 : i32
    %c0_i32_0 = arith.constant 0 : i32
    return %c0_i32, %arg1 : i32, i32
  }
  func.func @transform_3(%arg0: i32, %arg1: i32) -> (i32, i32) {
    %c0_i32 = arith.constant 0 : i32
    return %arg0, %arg1 : i32, i32
  }
}

module attributes {stable_mosaic.version = 11 : i64} {
  func.func @_linear_kernel(%arg0: i32, %arg1: i32, %arg2: memref<8x32xbf16, #tpu.memory_space<vmem>>, %arg3: memref<32x32xbf16, #tpu.memory_space<vmem>>, %arg4: memref<8x32xbf16, #tpu.memory_space<vmem>>) attributes {dimension_semantics = [#tpu.dimension_semantics<parallel>, #tpu.dimension_semantics<parallel>], iteration_bounds = array<i64: 2, 1>, scalar_prefetch = 0 : i64, scratch_operands = 0 : i64, tpu.core_type = #tpu.core_type<tc>, window_params = [{transform_indices = @transform_0, window_bounds = array<i64: 8, 32>}, {transform_indices = @transform_1, window_bounds = array<i64: 32, 32>}, {transform_indices = @transform_2, window_bounds = array<i64: 8, 32>}]} {
    %c0 = arith.constant 0 : index
    %c0_0 = arith.constant 0 : index
    %0 = vector.load %arg2[%c0, %c0_0] : memref<8x32xbf16, #tpu.memory_space<vmem>>, vector<8x32xbf16>
    %c0_1 = arith.constant 0 : index
    %c0_2 = arith.constant 0 : index
    %1 = vector.load %arg3[%c0_1, %c0_2] : memref<32x32xbf16, #tpu.memory_space<vmem>>, vector<32x32xbf16>
    %cst = arith.constant dense<0.000000e+00> : vector<8x32xf32>
    %2 = tpu.matmul %0, %1, %cst {dimension_numbers = #tpu.dot_dimension_numbers<[1], [0], [0], [1], [0, 0, 1, 1], [], []>} : vector<8x32xbf16>, vector<32x32xbf16>, vector<8x32xf32> -> vector<8x32xf32>
    %3 = arith.truncf %2 : vector<8x32xf32> to vector<8x32xbf16>
    %c0_3 = arith.constant 0 : index
    %c0_4 = arith.constant 0 : index
    %4 = vector.load %arg4[%c0_3, %c0_4] : memref<8x32xbf16, #tpu.memory_space<vmem>>, vector<8x32xbf16>
    tpu.vector_store %arg4[%c0_3, %c0_4], %3 {strides = array<i32>} : memref<8x32xbf16, #tpu.memory_space<vmem>>, vector<8x32xbf16>,
    return
  }
  func.func @transform_0(%arg0: i32, %arg1: i32) -> (i32, i32) {
    %c0_i32 = arith.constant 0 : i32
    %c0_i32_0 = arith.constant 0 : i32
    return %arg0, %c0_i32 : i32, i32
  }
  func.func @transform_1(%arg0: i32, %arg1: i32) -> (i32, i32) {
    %c0_i32 = arith.constant 0 : i32
    %c0_i32_0 = arith.constant 0 : i32
    return %c0_i32, %arg1 : i32, i32
  }
  func.func @transform_2(%arg0: i32, %arg1: i32) -> (i32, i32) {
    %c0_i32 = arith.constant 0 : i32
    return %arg0, %arg1 : i32, i32
  }
}

module attributes {stable_mosaic.version = 11 : i64} {
  func.func @_ffn_kernel(%arg0: i32, %arg1: i32, %arg2: memref<8x32xbf16, #tpu.memory_space<vmem>>, %arg3: memref<1x32xf32, #tpu.memory_space<vmem>>, %arg4: memref<32x64xbf16, #tpu.memory_space<vmem>>, %arg5: memref<32x64xbf16, #tpu.memory_space<vmem>>, %arg6: memref<64x32xbf16, #tpu.memory_space<vmem>>, %arg7: memref<8x32xbf16, #tpu.memory_space<vmem>>, %arg8: memref<8x32xbf16, #tpu.memory_space<vmem>>, %arg9: memref<8x32xf32, #tpu.memory_space<vmem>>) attributes {dimension_semantics = [#tpu.dimension_semantics<parallel>, #tpu.dimension_semantics<arbitrary>], iteration_bounds = array<i64: 2, 1>, scalar_prefetch = 0 : i64, scratch_operands = 2 : i64, tpu.core_type = #tpu.core_type<tc>, window_params = [{transform_indices = @transform_0, window_bounds = array<i64: 8, 32>}, {pipeline_mode = #tpu.pipeline_mode<synchronous>, transform_indices = @transform_1, window_bounds = array<i64: 1, 32>}, {transform_indices = @transform_2, window_bounds = array<i64: 32, 64>}, {transform_indices = @transform_3, window_bounds = array<i64: 32, 64>}, {transform_indices = @transform_4, window_bounds = array<i64: 64, 32>}, {transform_indices = @transform_5, window_bounds = array<i64: 8, 32>}]} {
    %c0_i32 = arith.constant 0 : i32
    %0 = arith.cmpi eq, %arg1, %c0_i32 : i32
    %1 = arith.extui %0 : i1 to i32
    %c0_i32_0 = arith.constant 0 : i32
    %2 = arith.cmpi ne, %1, %c0_i32_0 : i32
    scf.if %2 {
      %c0_17 = arith.constant 0 : index
      %c0_18 = arith.constant 0 : index
      %24 = vector.load %arg2[%c0_17, %c0_18] : memref<8x32xbf16, #tpu.memory_space<vmem>>, vector<8x32xbf16>
      %25 = arith.extf %24 : vector<8x32xbf16> to vector<8x32xf32>
      %26 = arith.mulf %25, %25 : vector<8x32xf32>
      %cst_19 = arith.constant dense<0.000000e+00> : vector<8xf32>
      %27 = vector.multi_reduction <add>, %26, %cst_19 [1] : vector<8x32xf32> to vector<8xf32>
      %28 = vector.shape_cast %27 : vector<8xf32> to vector<8x1xf32>
      %cst_20 = arith.constant 3.200000e+01 : f32
      %29 = vector.broadcast %cst_20 : f32 to vector<8x1xf32>
      %30 = arith.divf %28, %29 : vector<8x1xf32>
      %cst_21 = arith.constant 9.99999997E-7 : f32
      %31 = vector.broadcast %cst_21 : f32 to vector<8x1xf32>
      %32 = arith.addf %30, %31 : vector<8x1xf32>
      %33 = math.rsqrt %32 : vector<8x1xf32>
      %34 = vector.broadcast %33 : vector<8x1xf32> to vector<8x32xf32>
      %35 = arith.mulf %25, %34 : vector<8x32xf32>
      %c0_22 = arith.constant 0 : index
      %c0_23 = arith.constant 0 : index
      %36 = vector.load %arg3[%c0_22, %c0_23] : memref<1x32xf32, #tpu.memory_space<vmem>>, vector<1x32xf32>
      %37 = vector.broadcast %36 : vector<1x32xf32> to vector<8x32xf32>
      %38 = arith.mulf %35, %37 : vector<8x32xf32>
      %39 = arith.truncf %38 : vector<8x32xf32> to vector<8x32xbf16>
      %c0_24 = arith.constant 0 : index
      %c0_25 = arith.constant 0 : index
      %40 = vector.load %arg8[%c0_24, %c0_25] : memref<8x32xbf16, #tpu.memory_space<vmem>>, vector<8x32xbf16>
      tpu.vector_store %arg8[%c0_24, %c0_25], %39 {strides = array<i32>} : memref<8x32xbf16, #tpu.memory_space<vmem>>, vector<8x32xbf16>,
      %cst_26 = arith.constant 0.000000e+00 : f32
      %41 = vector.broadcast %cst_26 : f32 to vector<8x32xf32>
      %c0_27 = arith.constant 0 : index
      %c0_28 = arith.constant 0 : index
      %42 = vector.load %arg9[%c0_27, %c0_28] : memref<8x32xf32, #tpu.memory_space<vmem>>, vector<8x32xf32>
      tpu.vector_store %arg9[%c0_27, %c0_28], %41 {strides = array<i32>} : memref<8x32xf32, #tpu.memory_space<vmem>>, vector<8x32xf32>,
    } else {
    }
    %c0 = arith.constant 0 : index
    %c0_1 = arith.constant 0 : index
    %3 = vector.load %arg8[%c0, %c0_1] : memref<8x32xbf16, #tpu.memory_space<vmem>>, vector<8x32xbf16>
    %c0_2 = arith.constant 0 : index
    %c0_3 = arith.constant 0 : index
    %4 = vector.load %arg4[%c0_2, %c0_3] : memref<32x64xbf16, #tpu.memory_space<vmem>>, vector<32x64xbf16>
    %cst = arith.constant dense<0.000000e+00> : vector<8x64xf32>
    %5 = tpu.matmul %3, %4, %cst {dimension_numbers = #tpu.dot_dimension_numbers<[1], [0], [0], [1], [0, 0, 1, 1], [], []>} : vector<8x32xbf16>, vector<32x64xbf16>, vector<8x64xf32> -> vector<8x64xf32>
    %c0_4 = arith.constant 0 : index
    %c0_5 = arith.constant 0 : index
    %6 = vector.load %arg5[%c0_4, %c0_5] : memref<32x64xbf16, #tpu.memory_space<vmem>>, vector<32x64xbf16>
    %cst_6 = arith.constant dense<0.000000e+00> : vector<8x64xf32>
    %7 = tpu.matmul %3, %6, %cst_6 {dimension_numbers = #tpu.dot_dimension_numbers<[1], [0], [0], [1], [0, 0, 1, 1], [], []>} : vector<8x32xbf16>, vector<32x64xbf16>, vector<8x64xf32> -> vector<8x64xf32>
    %8 = arith.negf %5 : vector<8x64xf32>
    %9 = math.exp %8 : vector<8x64xf32>
    %cst_7 = arith.constant 1.000000e+00 : f32
    %10 = vector.broadcast %cst_7 : f32 to vector<8x64xf32>
    %11 = arith.addf %10, %9 : vector<8x64xf32>
    %12 = arith.divf %10, %11 : vector<8x64xf32>
    %13 = arith.mulf %5, %12 : vector<8x64xf32>
    %14 = arith.mulf %13, %7 : vector<8x64xf32>
    %c0_8 = arith.constant 0 : index
    %c0_9 = arith.constant 0 : index
    %15 = vector.load %arg9[%c0_8, %c0_9] : memref<8x32xf32, #tpu.memory_space<vmem>>, vector<8x32xf32>
    %16 = arith.truncf %14 : vector<8x64xf32> to vector<8x64xbf16>
    %c0_10 = arith.constant 0 : index
    %c0_11 = arith.constant 0 : index
    %17 = vector.load %arg6[%c0_10, %c0_11] : memref<64x32xbf16, #tpu.memory_space<vmem>>, vector<64x32xbf16>
    %cst_12 = arith.constant dense<0.000000e+00> : vector<8x32xf32>
    %18 = tpu.matmul %16, %17, %cst_12 {dimension_numbers = #tpu.dot_dimension_numbers<[1], [0], [0], [1], [0, 0, 1, 1], [], []>} : vector<8x64xbf16>, vector<64x32xbf16>, vector<8x32xf32> -> vector<8x32xf32>
    %19 = arith.addf %15, %18 : vector<8x32xf32>
    %c0_13 = arith.constant 0 : index
    %c0_14 = arith.constant 0 : index
    %20 = vector.load %arg9[%c0_13, %c0_14] : memref<8x32xf32, #tpu.memory_space<vmem>>, vector<8x32xf32>
    tpu.vector_store %arg9[%c0_13, %c0_14], %19 {strides = array<i32>} : memref<8x32xf32, #tpu.memory_space<vmem>>, vector<8x32xf32>,
    %c0_i32_15 = arith.constant 0 : i32
    %21 = arith.cmpi eq, %arg1, %c0_i32_15 : i32
    %22 = arith.extui %21 : i1 to i32
    %c0_i32_16 = arith.constant 0 : i32
    %23 = arith.cmpi ne, %22, %c0_i32_16 : i32
    scf.if %23 {
      %c0_17 = arith.constant 0 : index
      %c0_18 = arith.constant 0 : index
      %24 = vector.load %arg9[%c0_17, %c0_18] : memref<8x32xf32, #tpu.memory_space<vmem>>, vector<8x32xf32>
      %25 = arith.truncf %24 : vector<8x32xf32> to vector<8x32xbf16>
      %c0_19 = arith.constant 0 : index
      %c0_20 = arith.constant 0 : index
      %26 = vector.load %arg7[%c0_19, %c0_20] : memref<8x32xbf16, #tpu.memory_space<vmem>>, vector<8x32xbf16>
      tpu.vector_store %arg7[%c0_19, %c0_20], %25 {strides = array<i32>} : memref<8x32xbf16, #tpu.memory_space<vmem>>, vector<8x32xbf16>,
    } else {
    }
    return
  }
  func.func @transform_0(%arg0: i32, %arg1: i32) -> (i32, i32) {
    %c0_i32 = arith.constant 0 : i32
    %c0_i32_0 = arith.constant 0 : i32
    return %arg0, %c0_i32 : i32, i32
  }
  func.func @transform_1(%arg0: i32, %arg1: i32) -> (i32, i32) {
    %c0_i32 = arith.constant 0 : i32
    %c0_i32_0 = arith.constant 0 : i32
    %c0_i32_1 = arith.constant 0 : i32
    return %c0_i32, %c0_i32_0 : i32, i32
  }
  func.func @transform_2(%arg0: i32, %arg1: i32) -> (i32, i32) {
    %c0_i32 = arith.constant 0 : i32
    %c0_i32_0 = arith.constant 0 : i32
    return %c0_i32, %arg1 : i32, i32
  }
  func.func @transform_3(%arg0: i32, %arg1: i32) -> (i32, i32) {
    %c0_i32 = arith.constant 0 : i32
    %c0_i32_0 = arith.constant 0 : i32
    return %c0_i32, %arg1 : i32, i32
  }
  func.func @transform_4(%arg0: i32, %arg1: i32) -> (i32, i32) {
    %c0_i32 = arith.constant 0 : i32
    %c0_i32_0 = arith.constant 0 : i32
    return %arg1, %c0_i32 : i32, i32
  }
  func.func @transform_5(%arg0: i32, %arg1: i32) -> (i32, i32) {
    %c0_i32 = arith.constant 0 : i32
    %c0_i32_0 = arith.constant 0 : i32
    return %arg0, %c0_i32 : i32, i32
  }
}

module attributes {stable_mosaic.version = 11 : i64} {
  func.func @_reward_path_kernel(%arg0: i32, %arg1: memref<2x32xbf16, #tpu.memory_space<vmem>>, %arg2: memref<1x32xf32, #tpu.memory_space<vmem>>, %arg3: memref<32x64xbf16, #tpu.memory_space<vmem>>, %arg4: memref<32x64xbf16, #tpu.memory_space<vmem>>, %arg5: memref<64x32xbf16, #tpu.memory_space<vmem>>, %arg6: memref<1x32xf32, #tpu.memory_space<vmem>>, %arg7: memref<1x32xf32, #tpu.memory_space<vmem>>, %arg8: memref<1xf32, #tpu.memory_space<smem>>, %arg9: memref<2x128xf32, #tpu.memory_space<vmem>>, %arg10: memref<2x32xbf16, #tpu.memory_space<vmem>>, %arg11: memref<2x32xf32, #tpu.memory_space<vmem>>) attributes {dimension_semantics = [#tpu.dimension_semantics<arbitrary>], iteration_bounds = array<i64: 1>, scalar_prefetch = 0 : i64, scratch_operands = 2 : i64, tpu.core_type = #tpu.core_type<tc>, window_params = [{pipeline_mode = #tpu.pipeline_mode<synchronous>, transform_indices = @transform_0, window_bounds = array<i64: 2, 32>}, {pipeline_mode = #tpu.pipeline_mode<synchronous>, transform_indices = @transform_1, window_bounds = array<i64: 1, 32>}, {transform_indices = @transform_2, window_bounds = array<i64: 32, 64>}, {transform_indices = @transform_3, window_bounds = array<i64: 32, 64>}, {transform_indices = @transform_4, window_bounds = array<i64: 64, 32>}, {pipeline_mode = #tpu.pipeline_mode<synchronous>, transform_indices = @transform_5, window_bounds = array<i64: 1, 32>}, {pipeline_mode = #tpu.pipeline_mode<synchronous>, transform_indices = @transform_6, window_bounds = array<i64: 1, 32>}, {transform_indices = @transform_7, window_bounds = array<i64: 1>}, {pipeline_mode = #tpu.pipeline_mode<synchronous>, transform_indices = @transform_8, window_bounds = array<i64: 2, 128>}]} {
    %c0_i32 = arith.constant 0 : i32
    %0 = arith.cmpi eq, %arg0, %c0_i32 : i32
    %1 = arith.extui %0 : i1 to i32
    %c0_i32_0 = arith.constant 0 : i32
    %2 = arith.cmpi ne, %1, %c0_i32_0 : i32
    scf.if %2 {
      %c0_17 = arith.constant 0 : index
      %c0_18 = arith.constant 0 : index
      %24 = vector.load %arg1[%c0_17, %c0_18] : memref<2x32xbf16, #tpu.memory_space<vmem>>, vector<2x32xbf16>
      %25 = arith.extf %24 : vector<2x32xbf16> to vector<2x32xf32>
      %26 = arith.mulf %25, %25 : vector<2x32xf32>
      %cst_19 = arith.constant dense<0.000000e+00> : vector<2xf32>
      %27 = vector.multi_reduction <add>, %26, %cst_19 [1] : vector<2x32xf32> to vector<2xf32>
      %28 = vector.shape_cast %27 : vector<2xf32> to vector<2x1xf32>
      %cst_20 = arith.constant 3.200000e+01 : f32
      %29 = vector.broadcast %cst_20 : f32 to vector<2x1xf32>
      %30 = arith.divf %28, %29 : vector<2x1xf32>
      %cst_21 = arith.constant 9.99999997E-7 : f32
      %31 = vector.broadcast %cst_21 : f32 to vector<2x1xf32>
      %32 = arith.addf %30, %31 : vector<2x1xf32>
      %33 = math.rsqrt %32 : vector<2x1xf32>
      %34 = vector.broadcast %33 : vector<2x1xf32> to vector<2x32xf32>
      %35 = arith.mulf %25, %34 : vector<2x32xf32>
      %c0_22 = arith.constant 0 : index
      %c0_23 = arith.constant 0 : index
      %36 = vector.load %arg2[%c0_22, %c0_23] : memref<1x32xf32, #tpu.memory_space<vmem>>, vector<1x32xf32>
      %37 = vector.broadcast %36 : vector<1x32xf32> to vector<2x32xf32>
      %38 = arith.mulf %35, %37 : vector<2x32xf32>
      %39 = arith.truncf %38 : vector<2x32xf32> to vector<2x32xbf16>
      %c0_24 = arith.constant 0 : index
      %c0_25 = arith.constant 0 : index
      %40 = vector.load %arg10[%c0_24, %c0_25] : memref<2x32xbf16, #tpu.memory_space<vmem>>, vector<2x32xbf16>
      tpu.vector_store %arg10[%c0_24, %c0_25], %39 {strides = array<i32>} : memref<2x32xbf16, #tpu.memory_space<vmem>>, vector<2x32xbf16>,
      %cst_26 = arith.constant 0.000000e+00 : f32
      %41 = vector.broadcast %cst_26 : f32 to vector<2x32xf32>
      %c0_27 = arith.constant 0 : index
      %c0_28 = arith.constant 0 : index
      %42 = vector.load %arg11[%c0_27, %c0_28] : memref<2x32xf32, #tpu.memory_space<vmem>>, vector<2x32xf32>
      tpu.vector_store %arg11[%c0_27, %c0_28], %41 {strides = array<i32>} : memref<2x32xf32, #tpu.memory_space<vmem>>, vector<2x32xf32>,
    } else {
    }
    %c0 = arith.constant 0 : index
    %c0_1 = arith.constant 0 : index
    %3 = vector.load %arg10[%c0, %c0_1] : memref<2x32xbf16, #tpu.memory_space<vmem>>, vector<2x32xbf16>
    %c0_2 = arith.constant 0 : index
    %c0_3 = arith.constant 0 : index
    %4 = vector.load %arg3[%c0_2, %c0_3] : memref<32x64xbf16, #tpu.memory_space<vmem>>, vector<32x64xbf16>
    %cst = arith.constant dense<0.000000e+00> : vector<2x64xf32>
    %5 = tpu.matmul %3, %4, %cst {dimension_numbers = #tpu.dot_dimension_numbers<[1], [0], [0], [1], [0, 0, 1, 1], [], []>} : vector<2x32xbf16>, vector<32x64xbf16>, vector<2x64xf32> -> vector<2x64xf32>
    %c0_4 = arith.constant 0 : index
    %c0_5 = arith.constant 0 : index
    %6 = vector.load %arg4[%c0_4, %c0_5] : memref<32x64xbf16, #tpu.memory_space<vmem>>, vector<32x64xbf16>
    %cst_6 = arith.constant dense<0.000000e+00> : vector<2x64xf32>
    %7 = tpu.matmul %3, %6, %cst_6 {dimension_numbers = #tpu.dot_dimension_numbers<[1], [0], [0], [1], [0, 0, 1, 1], [], []>} : vector<2x32xbf16>, vector<32x64xbf16>, vector<2x64xf32> -> vector<2x64xf32>
    %8 = arith.negf %5 : vector<2x64xf32>
    %9 = math.exp %8 : vector<2x64xf32>
    %cst_7 = arith.constant 1.000000e+00 : f32
    %10 = vector.broadcast %cst_7 : f32 to vector<2x64xf32>
    %11 = arith.addf %10, %9 : vector<2x64xf32>
    %12 = arith.divf %10, %11 : vector<2x64xf32>
    %13 = arith.mulf %5, %12 : vector<2x64xf32>
    %14 = arith.mulf %13, %7 : vector<2x64xf32>
    %c0_8 = arith.constant 0 : index
    %c0_9 = arith.constant 0 : index
    %15 = vector.load %arg11[%c0_8, %c0_9] : memref<2x32xf32, #tpu.memory_space<vmem>>, vector<2x32xf32>
    %16 = arith.truncf %14 : vector<2x64xf32> to vector<2x64xbf16>
    %c0_10 = arith.constant 0 : index
    %c0_11 = arith.constant 0 : index
    %17 = vector.load %arg5[%c0_10, %c0_11] : memref<64x32xbf16, #tpu.memory_space<vmem>>, vector<64x32xbf16>
    %cst_12 = arith.constant dense<0.000000e+00> : vector<2x32xf32>
    %18 = tpu.matmul %16, %17, %cst_12 {dimension_numbers = #tpu.dot_dimension_numbers<[1], [0], [0], [1], [0, 0, 1, 1], [], []>} : vector<2x64xbf16>, vector<64x32xbf16>, vector<2x32xf32> -> vector<2x32xf32>
    %19 = arith.addf %15, %18 : vector<2x32xf32>
    %c0_13 = arith.constant 0 : index
    %c0_14 = arith.constant 0 : index
    %20 = vector.load %arg11[%c0_13, %c0_14] : memref<2x32xf32, #tpu.memory_space<vmem>>, vector<2x32xf32>
    tpu.vector_store %arg11[%c0_13, %c0_14], %19 {strides = array<i32>} : memref<2x32xf32, #tpu.memory_space<vmem>>, vector<2x32xf32>,
    %c0_i32_15 = arith.constant 0 : i32
    %21 = arith.cmpi eq, %arg0, %c0_i32_15 : i32
    %22 = arith.extui %21 : i1 to i32
    %c0_i32_16 = arith.constant 0 : i32
    %23 = arith.cmpi ne, %22, %c0_i32_16 : i32
    scf.if %23 {
      %c0_17 = arith.constant 0 : index
      %c0_18 = arith.constant 0 : index
      %24 = vector.load %arg11[%c0_17, %c0_18] : memref<2x32xf32, #tpu.memory_space<vmem>>, vector<2x32xf32>
      %25 = arith.mulf %24, %24 : vector<2x32xf32>
      %cst_19 = arith.constant dense<0.000000e+00> : vector<2xf32>
      %26 = vector.multi_reduction <add>, %25, %cst_19 [1] : vector<2x32xf32> to vector<2xf32>
      %27 = vector.shape_cast %26 : vector<2xf32> to vector<2x1xf32>
      %cst_20 = arith.constant 3.200000e+01 : f32
      %28 = vector.broadcast %cst_20 : f32 to vector<2x1xf32>
      %29 = arith.divf %27, %28 : vector<2x1xf32>
      %cst_21 = arith.constant 9.99999997E-7 : f32
      %30 = vector.broadcast %cst_21 : f32 to vector<2x1xf32>
      %31 = arith.addf %29, %30 : vector<2x1xf32>
      %32 = math.rsqrt %31 : vector<2x1xf32>
      %33 = vector.broadcast %32 : vector<2x1xf32> to vector<2x32xf32>
      %34 = arith.mulf %24, %33 : vector<2x32xf32>
      %c0_22 = arith.constant 0 : index
      %c0_23 = arith.constant 0 : index
      %35 = vector.load %arg6[%c0_22, %c0_23] : memref<1x32xf32, #tpu.memory_space<vmem>>, vector<1x32xf32>
      %36 = vector.broadcast %35 : vector<1x32xf32> to vector<2x32xf32>
      %37 = arith.mulf %34, %36 : vector<2x32xf32>
      %c0_24 = arith.constant 0 : index
      %c0_25 = arith.constant 0 : index
      %38 = vector.load %arg7[%c0_24, %c0_25] : memref<1x32xf32, #tpu.memory_space<vmem>>, vector<1x32xf32>
      %39 = vector.broadcast %38 : vector<1x32xf32> to vector<2x32xf32>
      %40 = arith.mulf %37, %39 : vector<2x32xf32>
      %cst_26 = arith.constant dense<0.000000e+00> : vector<2xf32>
      %41 = vector.multi_reduction <add>, %40, %cst_26 [1] : vector<2x32xf32> to vector<2xf32>
      %42 = vector.shape_cast %41 : vector<2xf32> to vector<2x1xf32>
      %c0_27 = arith.constant 0 : index
      %43 = memref.load %arg8[%c0_27] : memref<1xf32, #tpu.memory_space<smem>>
      %44 = vector.broadcast %43 : f32 to vector<2x1xf32>
      %45 = arith.addf %42, %44 : vector<2x1xf32>
      %46 = vector.shape_cast %45 : vector<2x1xf32> to vector<2x1xf32>
      %47 = vector.broadcast %46 : vector<2x1xf32> to vector<2x128xf32>
      %c0_28 = arith.constant 0 : index
      %c0_29 = arith.constant 0 : index
      %48 = vector.load %arg9[%c0_28, %c0_29] : memref<2x128xf32, #tpu.memory_space<vmem>>, vector<2x128xf32>
      tpu.vector_store %arg9[%c0_28, %c0_29], %47 {strides = array<i32>} : memref<2x128xf32, #tpu.memory_space<vmem>>, vector<2x128xf32>,
    } else {
    }
    return
  }
  func.func @transform_0(%arg0: i32) -> (i32, i32) {
    %c0_i32 = arith.constant 0 : i32
    %c0_i32_0 = arith.constant 0 : i32
    %c0_i32_1 = arith.constant 0 : i32
    return %c0_i32, %c0_i32_0 : i32, i32
  }
  func.func @transform_1(%arg0: i32) -> (i32, i32) {
    %c0_i32 = arith.constant 0 : i32
    %c0_i32_0 = arith.constant 0 : i32
    %c0_i32_1 = arith.constant 0 : i32
    return %c0_i32, %c0_i32_0 : i32, i32
  }
  func.func @transform_2(%arg0: i32) -> (i32, i32) {
    %c0_i32 = arith.constant 0 : i32
    %c0_i32_0 = arith.constant 0 : i32
    return %c0_i32, %arg0 : i32, i32
  }
  func.func @transform_3(%arg0: i32) -> (i32, i32) {
    %c0_i32 = arith.constant 0 : i32
    %c0_i32_0 = arith.constant 0 : i32
    return %c0_i32, %arg0 : i32, i32
  }
  func.func @transform_4(%arg0: i32) -> (i32, i32) {
    %c0_i32 = arith.constant 0 : i32
    %c0_i32_0 = arith.constant 0 : i32
    return %arg0, %c0_i32 : i32, i32
  }
  func.func @transform_5(%arg0: i32) -> (i32, i32) {
    %c0_i32 = arith.constant 0 : i32
    %c0_i32_0 = arith.constant 0 : i32
    %c0_i32_1 = arith.constant 0 : i32
    return %c0_i32, %c0_i32_0 : i32, i32
  }
  func.func @transform_6(%arg0: i32) -> (i32, i32) {
    %c0_i32 = arith.constant 0 : i32
    %c0_i32_0 = arith.constant 0 : i32
    %c0_i32_1 = arith.constant 0 : i32
    return %c0_i32, %c0_i32_0 : i32, i32
  }
  func.func @transform_7(%arg0: i32) -> i32 {
    %c0_i32 = arith.constant 0 : i32
    %c0_i32_0 = arith.constant 0 : i32
    return %c0_i32 : i32
  }
  func.func @transform_8(%arg0: i32) -> (i32, i32) {
    %c0_i32 = arith.constant 0 : i32
    %c0_i32_0 = arith.constant 0 : i32
    %c0_i32_1 = arith.constant 0 : i32
    return %c0_i32, %c0_i32_0 : i32, i32
  }
}

</mosaic_0001>

<bundles_post_ra>
// kernel: reward_model_forward.8
= control target key start
LH: loop header
LB: loop body
LE: loop exit
PB: predicated region body
PF: predicated region fallthrough
CT: control target
= control target key end

     0   :  { %7 = vsyncpa [#allocation3], 0  ;;  %s856_s0 = inlined_call_operand.hbm [shape: bf16[16,32], index: 0, kind: input, shape index: {}]   ;;  %s857_s1 = inlined_call_operand.hbm [shape: bf16[32,32], index: 1, kind: input, shape index: {}]   ;;  %s858_s2 = inlined_call_operand.hbm [shape: bf16[16,32], index: 2, kind: output, shape index: {}]  }
   0x1   :  { %9 = vsyncpa [#allocation3 + $0x1], 0 }
   0x2   :  { %10 = vsyncpa [#allocation6], 0 }
   0x3   :  { %11 = vsyncpa [#allocation4], 0 }
   0x4   :  { %13 = vsyncpa [#allocation4 + $0x1], 0  ;;  %s642_s9 = smov 0   ;;  %s644_s10 = smov 0  }
   0x5   :  { %s646_s11 = smov 0   ;;  %s648_s12 = smov 0  }
   0x6   :  { %s650_s13 = smov 0   ;;  %s652_s14 = smov 0  }
   0x7 LB: > { %s366_s15 = sadd.s32 4294967295, %s618_s14   ;;  %s367_s16 = sadd.s32 4294967294, %s618_s14   ;;  %s618_s14 = sphi %s652_s14, %s19_s14   ;;  %s614_s13 = sphi %s650_s13, %s882_s13   ;;  %s610_s12 = sphi %s648_s12, %s881_s12   ;;  %s606_s11 = sphi %s646_s11, %s880_s11   ;;  %s602_s10 = sphi %s644_s10, %s879_s10   ;;  %s598_s9 = sphi %s642_s9, %s878_s9  }
   0x8   : > { %p51_p0 = scmp.ne.s32.totalorder %s602_s10, %s598_s9  ;;  %p676_p1 = scmp.eq.s32.totalorder %s366_s15, 0 }
   0x9   : > { %p680_p2 = scmp.eq.s32.totalorder %s366_s15, 1  ;;  %p109_p3 = scmp.eq.s32.totalorder %s367_s16, 1 }
   0xa   : > { %s863_s17 = scalar_select %p676_p1, 1, 0 }
   0xb   : > { %s864_s18 = scalar_select %p680_p2, 1, 0 }
   0xc   : > { %p686_p4 = por %p676_p1, %p51_p0  ;;  %p368_p5 = scmp.ge.s32.totalorder %s618_s14, 1 }
   0xd   : > { %p691_p6 = por %p109_p3, %p51_p0  ;;  %p116_p7 = scmp.lt.s32.totalorder %s618_s14, 3 }
   0xe   : > { %s865_s19 = scalar_select %p686_p4, 1, 0 }
   0xf   : > { %s866_s20 = scalar_select %p691_p6, 1, 0 }
  0x10   : > { %p696_p8 = pnand %p368_p5, %p116_p7  ;;  %s620_s22 = smov [#allocation5]  }
  0x11   : > { %s130_s23 = sshll.u32 %s620_s22, 4  ;;  %s31_s25 = sadd.s32 1, %s614_s13  ;;  %s131_s23 = int_to_ptr.vmem [resolvable:$true] %s130_s23 }
  0x12   : > { %s867_s21 = scalar_select %p696_p8, 1, 0 }
  0x13   : > { %p403_p9 = pneg %p696_p8  ;;  %s474_s28 = scalar_lea.hbm %s857_s1, 256 }
  0x14   : > { %p475_p12 = scmp.ne.s32.totalorder %s857_s1, %s474_s28  ;;  %p481_p5 = scmp.lt.u32.totalorder %s474_s28, %s857_s1 }
  0x15   : > { %p705_p11 = pnand %p403_p9, %p676_p1 }
  0x17   : > { %p476_p13 = pneg %p705_p11 }
  0x19   : > { %p477_p0 = pnand %p476_p13, %p475_p12 }
  0x1b   : > { %p478_p3 = pneg %p477_p0 }
  0x1d   : > { %p483_p7 = pnand %p481_p5, %p478_p3 }
  0x1f   : > { %486 = shalt.err (!%p483_p7)
}
  0x20   : > { %s487_s5 = scalar_lea.vmem %s131_s23, 256  ;;  %p495_p1 = scmp.lt.s32.totalorder %s131_s23, %s131_s23 }
  0x21   : > { %p488_p9 = scmp.ne.s32.totalorder %s131_s23, %s487_s5  ;;  %p496_p4 = scmp.lt.s32.totalorder %s487_s5, %s487_s5 }
  0x23   : > { %p490_p10 = pnand %p488_p9, %p476_p13  ;;  %p497_p8 = por %p496_p4, %p495_p1 }
  0x25   : > { %p491_p6 = pneg %p490_p10 }
  0x27   : > { %p498_p2 = pnand %p497_p8, %p491_p6 }
  0x29   : > { %501 = shalt.err (!%p498_p2)
}
  0x2a   : > { %s621_s6 = smov 64   ;;  %s622_s7 = smov 4  }
  0x2b   : > { %406 = dma.hbm_to_vmem [thread:$0]  (!%p705_p11), %s857_s1, 256, %s131_s23, [#allocation6], %s621_s6, %s621_s6, %s622_s7  }
  0x2c   : > { %p33_p1 = scmp.ge.s32.totalorder %s31_s25, 2  ;;  %s38_s16 = sadd.s32 1, %s606_s11 }
  0x2d   : > { %p45_p2 = scmp.ne.s32.totalorder %s606_s11, %s602_s10  ;;  %p46_p4 = scmp.eq.s32.totalorder %s618_s14, 0 }
  0x2e   : > { %s884_s25 = smov (%p33_p1, %s31_s25), 0  ;;  %p870_p8 = scmp.ne.s32.totalorder %s864_s18, 0 }
  0x2f   : > { %p732_p6 = por %p46_p4, %p45_p2  ;;  %s35_s24 = ssub.s32 %s614_s13, %s884_s25 }
  0x30   : > { %p738_p10 = por %p870_p8, %p45_p2  ;;  %p416_p12 = scmp.lt.s32.totalorder %s618_s14, 2 }
  0x31   : > { %p36_p11 = scmp.eq.s32.totalorder %s35_s24, 0  ;;  %s144_s23 = sand.u32 1, %s606_s11  }
  0x32   : > { %s371_s27 = sshll.u32 %s144_s23, 2  ;;  %s372_s29 = sshll.u32 %s614_s13, 6 }
  0x33   : > { %s747_s28 = scalar_select %p36_p11, %s606_s11, %s38_s16  }
  0x34   : > { %s753_s4 = scalar_lea.hbm %s856_s0, %s372_s29  ;;  %s148_s18 = scalar_lea.vmem [#allocation2], %s371_s27 }
  0x35   : > { %s155_s5 = sshll.u32 %s148_s18, 4  ;;  %p759_p13 = pnand %p416_p12, %p732_p6  ;;  %s755_s5 = int_to_ptr.vmem [resolvable:$true] %s155_s5 }
  0x36   : > { %s145_s7 = scalar_lea.sflag [#allocation3], %s144_s23  ;;  %s502_s8 = scalar_lea.hbm %s753_s4, 64 }
  0x37   : > { %p503_p0 = scmp.ne.s32.totalorder %s753_s4, %s502_s8  ;;  %p504_p3 = pneg %p759_p13 }
  0x38   : > { %s507_s24 = scalar_lea.hbm %s856_s0, 128  ;;  %p508_p9 = scmp.lt.u32.totalorder %s753_s4, %s856_s0 }
  0x39   : > { %p505_p5 = pnand %p504_p3, %p503_p0  ;;  %p509_p1 = scmp.lt.u32.totalorder %s507_s24, %s502_s8 }
  0x3a   : > { %p511_p4 = scmp.lt.u32.totalorder %s502_s8, %s753_s4 }
  0x3b   : > { %p506_p7 = pneg %p505_p5  ;;  %p510_p2 = por %p509_p1, %p508_p9 }
  0x3d   : > { %p512_p6 = por %p511_p4, %p510_p2 }
  0x3f   : > { %p513_p8 = pnand %p512_p6, %p506_p7 }
  0x41   : > { %516 = shalt.err (!%p513_p8)
}
  0x42   : > { %s517_s23 = scalar_lea.vmem %s755_s5, 64  ;;  %s623_s29 = smov [#allocation2]  }
  0x43   : > { %p518_p12 = scmp.ne.s32.totalorder %s755_s5, %s517_s23  ;;  %s522_s30 = sshll.u32 %s623_s29, 4  ;;  %s523_s30 = int_to_ptr.vmem [resolvable:$false] %s522_s30 }
  0x44   : > { %s524_s3 = scalar_lea.vmem %s523_s30, 128  ;;  %p525_p5 = scmp.lt.s32.totalorder %s755_s5, %s523_s30 }
  0x45   : > { %p520_p11 = pnand %p518_p12, %p504_p3  ;;  %p526_p9 = scmp.lt.s32.totalorder %s524_s3, %s517_s23 }
  0x47   : > { %p521_p0 = pneg %p520_p11  ;;  %p527_p1 = por %p526_p9, %p525_p5 }
  0x49   : > { %p528_p2 = pnand %p527_p1, %p521_p0 }
  0x4b   : > { %531 = shalt.err (!%p528_p2)
}
  0x4c   : > { %410 = dma.hbm_to_vmem [thread:$0]  (!%p759_p13), %s753_s4, 64, %s755_s5, %s145_s7  }
  0x4d   : > { %p873_p7 = scmp.ne.s32.totalorder %s867_s21, 0 }
  0x4e   : > { %s791_s18 = sand.u32 (!%p873_p7), 1, %s602_s10   ;;  %p874_p3 = scmp.ne.s32.totalorder (!%p873_p7), %s865_s19, 0 }
  0x4f   : > { %164 = sbr.rel (%p873_p7) target bundleno = 327 (0x147), region = 28  ;;  %s374_s8 = sshll.u32 (!%p873_p7), %s791_s18, 2 }
  0x50   : > { %s167_s15 = scalar_lea.sflag (!%p873_p7), [#allocation3], %s791_s18  ;;  %s170_s16 = scalar_lea.vmem (!%p873_p7), [#allocation2], %s374_s8 }
  0x56   : > { %585 = dma.done.wait (%p874_p3), %s167_s15, 64  }
  0x57   : > { %587 = vsyncadd (%p874_p3), %s167_s15, 4294967232  ;;  %p875_p4 = scmp.ne.s32.totalorder %s863_s17, 0 }
  0x59   : > { %589 = dma.done.wait (%p875_p4), [#allocation6], 256  }
  0x5a   : > { %591 = vsyncadd (%p875_p4), [#allocation6], 4294967040  ;;  %v624_v0 = vmov 0.0   ;;  %vm625_vm0 = vmmov 0   ;;  %v472_v1 = vld [vmem:[#allocation5] sm:$0xff]   ;;  %v473_v2 = vld [vmem:[#allocation5 + $0x8] sm:$0xff]  }
  0x5b   : > { %387 = vmatprep.subr.bf16.mxu0 %v624_v0  ;;  %391 = vmatprep.mubr.msk.bf16.mxu0 %vm625_vm0, %v624_v0  ;;  %v196_v3 = vld [vmem:[%s170_s16] sm:$0xf]  ;;  %vm213_vm1 = vcmask 261120   ;;  %s381_s19 = sshll.u32 %s610_s12, 6  ;;  %s194_s21 = scalar_lea.vmem [#allocation7], %s374_s8  ;;  %vm258_vm2 = vcmask 257024  }
  0x5c   : > { %388 = vmatpush3.bf16.msra.mxu0 %v472_v1  ;;  %s275_s4 = sshll.u32 %s194_s21, 4  ;;  %s807_s6 = scalar_lea.hbm %s858_s2, %s381_s19  ;;  %s809_s4 = int_to_ptr.vmem [resolvable:$true] %s275_s4 }
  0x5d   : > { %389 = vmatprep.subr.bf16.mxu0 %v624_v0  ;;  %s261_s12 = scalar_lea.sflag [#allocation4], %s791_s18  ;;  %s532_s7 = scalar_lea.vmem %s809_s4, 64 }
  0x5e   : > { %p533_p13 = scmp.ne.s32.totalorder %s809_s4, %s532_s7  ;;  %s626_s24 = smov [#allocation7]  }
  0x5f   : > { %s536_s22 = sshll.u32 %s626_s24, 4  ;;  %s537_s22 = int_to_ptr.vmem [resolvable:$false] %s536_s22 }
  0x60   : > { %390 = vmatpush3.bf16.msra.mxu0 %v473_v2  ;;  %p534_p6 = pnand %p533_p13, %p738_p10  ;;  %s538_s27 = scalar_lea.vmem %s537_s22, 128 }
  0x61   : > { %p539_p12 = scmp.lt.s32.totalorder %s809_s4, %s537_s22  ;;  %p540_p11 = scmp.lt.s32.totalorder %s538_s27, %s532_s7 }
  0x62   : > { %p535_p8 = pneg %p534_p6 }
  0x63   : > { %392 = vmatmul.mubr.msk.bf16.vlgmr.msra.gmra.mrb[0].mxu0 %vm213_vm1, %v196_v3  ;;  %p541_p0 = por %p540_p11, %p539_p12 }
  0x65   : > { %p542_p5 = pnand %p541_p0, %p535_p8 }
 0x136   : > { %v251_v4 = vpop.f32.mrb[0].mxu0 }
 0x137   : > { %v257_v5 = vpack.c.bf16 %v251_v4, %v251_v4  ;;  %v393_v6 = vpop.f32.mrb[1].mxu0 }
 0x138   : > { %v254_v7 = vpop.f32.mrb[2].mxu0 }
 0x139   : > { %v394_v8 = vpop.f32.mrb[3].mxu0  ;;  %259 = vst.msk [vmem:[%s194_s21] sm:$0xf] %vm258_vm2, %v257_v5 }
 0x13a   : > { %545 = shalt.err (!%p542_p5)
}
 0x13b   : > { %s546_s23 = scalar_lea.hbm %s807_s6, 64  ;;  %s550_s3 = scalar_lea.hbm %s858_s2, 128 }
 0x13c   : > { %p547_p9 = scmp.ne.s32.totalorder %s807_s6, %s546_s23  ;;  %p551_p7 = scmp.lt.u32.totalorder %s807_s6, %s858_s2 }
 0x13d   : > { %p552_p3 = scmp.lt.u32.totalorder %s550_s3, %s546_s23  ;;  %p554_p13 = scmp.lt.u32.totalorder %s546_s23, %s807_s6 }
 0x13e   : > { %p548_p1 = pnand %p547_p9, %p738_p10 }
 0x13f   : > { %p553_p4 = por %p552_p3, %p551_p7 }
 0x140   : > { %p549_p2 = pneg %p548_p1 }
 0x141   : > { %p555_p6 = por %p554_p13, %p553_p4 }
 0x143   : > { %p556_p8 = pnand %p555_p6, %p549_p2 }
 0x145   : > { %559 = shalt.err (!%p556_p8)
}
 0x146   : > { %401 = dma.vmem_to_hbm [thread:$0]  (%p738_p10), %s809_s4, 64, %s807_s6, %s261_s12  }
 0x147 PF: > { %s287_s15 = sand.u32 1, %s598_s9   ;;  %p876_p12 = scmp.ne.s32.totalorder %s866_s20, 0 }
 0x148   : > { %p877_p11 = scmp.ge.s32.totalorder %s618_s14, 2  ;;  %s288_s16 = scalar_lea.sflag [#allocation4], %s287_s15 }
 0x14a   : > { %p412_p0 = pnand %p877_p11, %p876_p12 }
 0x14c   : > { %593 = dma.done.wait (!%p412_p0), %s288_s16, 64  }
 0x14d   : > { %595 = vsyncadd (!%p412_p0), %s288_s16, 4294967232  ;;  %s19_s14 = sadd.s32 1, %s618_s14   ;;  %s878_s9 = smov %s602_s10 }
 0x14e   : > { %p16_p5 = scmp.ge.s32.totalorder %s19_s14, 4   ;;  %s879_s10 = smov %s606_s11 }
 0x14f   : > { %s880_s11 = smov %s747_s28  ;;  %s881_s12 = smov %s614_s13 }
 0x150   : > { %s882_s13 = smov %s884_s25  ;;  %18 = sbr.rel (!%p16_p5) target bundleno = 7 (0x7), region = 78 }
 0x157   :  { %293 = vsyncpa [#allocation3], 1 }
 0x158   :  { %295 = vsyncpa [#allocation3 + $0x1], 1 }
 0x159   :  { %296 = vsyncpa [#allocation6], 1 }
 0x15a   :  { %297 = vsyncpa [#allocation4], 1 }
 0x15b   :  { %299 = vsyncpa [#allocation4 + $0x1], 1 }

// kernel: reward_model_forward.7
= control target key start
LH: loop header
LB: loop body
LE: loop exit
PB: predicated region body
PF: predicated region fallthrough
CT: control target
= control target key end

     0   :  { %8 = vsyncpa [#allocation4], 0  ;;  %s1015_s0 = inlined_call_operand.hbm [shape: bf16[16,32], index: 0, kind: input, shape index: {}]   ;;  %s1016_s1 = inlined_call_operand.hbm [shape: f32[1,32], index: 1, kind: input, shape index: {}]   ;;  %s1017_s2 = inlined_call_operand.hbm [shape: bf16[32,96], index: 2, kind: input, shape index: {}]   ;;  %s1018_s3 = inlined_call_operand.hbm [shape: bf16[16,96], index: 3, kind: output, shape index: {}]  }
   0x1   :  { %10 = vsyncpa [#allocation4 + $0x1], 0 }
   0x2   :  { %11 = vsyncpa [#allocation7], 0 }
   0x3   :  { %12 = vsyncpa [#allocation5], 0 }
   0x4   :  { %14 = vsyncpa [#allocation5 + $0x1], 0  ;;  %s766_s12 = smov 0   ;;  %s768_s13 = smov 0  }
   0x5   :  { %s770_s14 = smov 0   ;;  %s772_s15 = smov 0  }
   0x6   :  { %s774_s16 = smov 0   ;;  %s776_s17 = smov 0  }
   0x7 LB: > { %s441_s18 = sadd.s32 4294967295, %s736_s17   ;;  %s442_s19 = sadd.s32 4294967294, %s736_s17   ;;  %s736_s17 = sphi %s776_s17, %s20_s17   ;;  %s732_s16 = sphi %s774_s16, %s1041_s16   ;;  %s728_s15 = sphi %s772_s15, %s1040_s15   ;;  %s724_s14 = sphi %s770_s14, %s1039_s14   ;;  %s720_s13 = sphi %s768_s13, %s1038_s13   ;;  %s716_s12 = sphi %s766_s12, %s1037_s12  }
   0x8   : > { %p52_p0 = scmp.ne.s32.totalorder %s720_s13, %s716_s12  ;;  %p800_p1 = scmp.eq.s32.totalorder %s441_s18, 0 }
   0x9   : > { %p804_p2 = scmp.eq.s32.totalorder %s441_s18, 1  ;;  %p131_p3 = scmp.eq.s32.totalorder %s442_s19, 1 }
   0xa   : > { %s1023_s20 = scalar_select %p800_p1, 1, 0 }
   0xb   : > { %s1024_s21 = scalar_select %p804_p2, 1, 0 }
   0xc   : > { %p810_p4 = por %p800_p1, %p52_p0  ;;  %p443_p5 = scmp.ge.s32.totalorder %s736_s17, 1 }
   0xd   : > { %p815_p6 = por %p131_p3, %p52_p0  ;;  %p138_p7 = scmp.lt.s32.totalorder %s736_s17, 3 }
   0xe   : > { %s1025_s22 = scalar_select %p810_p4, 1, 0 }
   0xf   : > { %s1026_s23 = scalar_select %p815_p6, 1, 0 }
  0x10   : > { %p820_p8 = pnand %p443_p5, %p138_p7  ;;  %s738_s25 = smov [#allocation6]  }
  0x11   : > { %s151_s26 = sshll.u32 %s738_s25, 4  ;;  %s739_s27 = smov [#allocation8]   ;;  %s152_s26 = int_to_ptr.vmem [resolvable:$true] %s151_s26 }
  0x12   : > { %s1027_s24 = scalar_select %p820_p8, 1, 0 }
  0x13   : > { %p485_p10 = pneg %p820_p8  ;;  %s163_s28 = sshll.u32 %s739_s27, 4  ;;  %s833_s28 = int_to_ptr.vmem [resolvable:$true] %s163_s28 }
  0x14   : > { %s564_s5 = scalar_lea.hbm %s1016_s1, 16 }
  0x15   : > { %p829_p11 = pnand %p485_p10, %p800_p1  ;;  %p565_p12 = scmp.ne.s32.totalorder %s1016_s1, %s564_s5 }
  0x16   : > { %p571_p5 = scmp.lt.u32.totalorder %s564_s5, %s1016_s1 }
  0x17   : > { %p566_p13 = pneg %p829_p11 }
  0x19   : > { %p567_p0 = pnand %p566_p13, %p565_p12 }
  0x1b   : > { %p568_p3 = pneg %p567_p0 }
  0x1d   : > { %p573_p7 = pnand %p571_p5, %p568_p3 }
  0x1f   : > { %576 = shalt.err (!%p573_p7)
}
  0x20   : > { %s577_s10 = scalar_lea.vmem %s152_s26, 16  ;;  %s584_s11 = scalar_lea.vmem %s152_s26, 32 }
  0x21   : > { %p578_p10 = scmp.ne.s32.totalorder %s152_s26, %s577_s10  ;;  %p585_p1 = scmp.lt.s32.totalorder %s152_s26, %s152_s26 }
  0x22   : > { %p586_p4 = scmp.lt.s32.totalorder %s584_s11, %s577_s10 }
  0x23   : > { %p580_p9 = pnand %p578_p10, %p566_p13 }
  0x24   : > { %p587_p8 = por %p586_p4, %p585_p1 }
  0x25   : > { %p581_p6 = pneg %p580_p9 }
  0x27   : > { %p588_p2 = pnand %p587_p8, %p581_p6 }
  0x29   : > { %591 = shalt.err (!%p588_p2)
}
  0x2a   : > { %488 = dma.hbm_to_vmem [thread:$0]  (!%p829_p11), %s1016_s1, 16, %s152_s26, [#allocation7]  }
  0x2b   : > { %s592_s30 = scalar_lea.hbm %s1017_s2, 256 }
  0x2c   : > { %p593_p9 = scmp.ne.s32.totalorder %s1017_s2, %s592_s30  ;;  %p599_p2 = scmp.lt.u32.totalorder %s592_s30, %s1017_s2 }
  0x2e   : > { %p595_p1 = pnand %p593_p9, %p566_p13 }
  0x30   : > { %p596_p4 = pneg %p595_p1 }
  0x32   : > { %p601_p6 = pnand %p599_p2, %p596_p4 }
  0x34   : > { %604 = shalt.err (!%p601_p6)
}
  0x35   : > { %s605_s26 = scalar_lea.vmem %s833_s28, 256  ;;  %p613_p3 = scmp.lt.s32.totalorder %s833_s28, %s833_s28 }
  0x36   : > { %p606_p8 = scmp.ne.s32.totalorder %s833_s28, %s605_s26  ;;  %p614_p5 = scmp.lt.s32.totalorder %s605_s26, %s605_s26 }
  0x38   : > { %p608_p12 = pnand %p606_p8, %p566_p13  ;;  %p615_p7 = por %p614_p5, %p613_p3 }
  0x3a   : > { %p609_p0 = pneg %p608_p12 }
  0x3c   : > { %p616_p10 = pnand %p615_p7, %p609_p0 }
  0x3e   : > { %619 = shalt.err (!%p616_p10)
}
  0x3f   : > { %s740_s8 = smov 64   ;;  %s741_s9 = smov 4  }
  0x40   : > { %491 = dma.hbm_to_vmem [thread:$0]  (!%p829_p11), %s1017_s2, 256, %s833_s28, [#allocation7], %s740_s8, %s740_s8, %s741_s9  }
  0x41   : > { %s32_s18 = sadd.s32 1, %s732_s16  ;;  %s39_s19 = sadd.s32 1, %s724_s14 }
  0x42   : > { %p34_p13 = scmp.ge.s32.totalorder %s32_s18, 2  ;;  %p46_p9 = scmp.ne.s32.totalorder %s724_s14, %s720_s13 }
  0x43   : > { %p47_p1 = scmp.eq.s32.totalorder %s736_s17, 0  ;;  %p502_p4 = scmp.lt.s32.totalorder %s736_s17, 2 }
  0x44   : > { %s1043_s18 = smov (%p34_p13, %s32_s18), 0  ;;  %p1029_p6 = scmp.ne.s32.totalorder %s1024_s21, 0 }
  0x45   : > { %p48_p2 = por %p47_p1, %p46_p9  ;;  %s36_s29 = ssub.s32 %s732_s16, %s1043_s18 }
  0x46   : > { %p892_p8 = por %p1029_p6, %p46_p9  ;;  %s177_s27 = sand.u32 1, %s724_s14  }
  0x47   : > { %p37_p12 = scmp.eq.s32.totalorder %s36_s29, 0  ;;  %s447_s28 = sshll.u32 %s177_s27, 2 }
  0x48   : > { %s448_s30 = sshll.u32 %s732_s16, 6  ;;  %s181_s21 = scalar_lea.vmem [#allocation3], %s447_s28 }
  0x49   : > { %s901_s4 = scalar_select %p37_p12, %s724_s14, %s39_s19  }
  0x4a   : > { %s906_s7 = scalar_lea.hbm %s1015_s0, %s448_s30  ;;  %s188_s26 = sshll.u32 %s181_s21, 4  ;;  %s914_s26 = int_to_ptr.vmem [resolvable:$true] %s188_s26 }
  0x4b   : > { %p910_p11 = pnand %p502_p4, %p48_p2  ;;  %s178_s9 = scalar_lea.sflag [#allocation4], %s177_s27 }
  0x4c   : > { %s620_s10 = scalar_lea.hbm %s906_s7, 64  ;;  %s625_s29 = scalar_lea.hbm %s1015_s0, 128 }
  0x4d   : > { %p621_p0 = scmp.ne.s32.totalorder %s906_s7, %s620_s10  ;;  %p622_p3 = pneg %p910_p11 }
  0x4e   : > { %p626_p10 = scmp.lt.u32.totalorder %s906_s7, %s1015_s0  ;;  %p627_p13 = scmp.lt.u32.totalorder %s625_s29, %s620_s10 }
  0x4f   : > { %p623_p5 = pnand %p622_p3, %p621_p0  ;;  %p629_p1 = scmp.lt.u32.totalorder %s620_s10, %s906_s7 }
  0x50   : > { %p628_p9 = por %p627_p13, %p626_p10 }
  0x51   : > { %p624_p7 = pneg %p623_p5 }
  0x52   : > { %p630_p4 = por %p629_p1, %p628_p9 }
  0x54   : > { %p631_p2 = pnand %p630_p4, %p624_p7 }
  0x56   : > { %634 = shalt.err (!%p631_p2)
}
  0x57   : > { %s635_s27 = scalar_lea.vmem %s914_s26, 64  ;;  %s742_s5 = smov [#allocation3]  }
  0x58   : > { %p636_p6 = scmp.ne.s32.totalorder %s914_s26, %s635_s27  ;;  %s640_s6 = sshll.u32 %s742_s5, 4  ;;  %s641_s6 = int_to_ptr.vmem [resolvable:$false] %s640_s6 }
  0x59   : > { %s642_s21 = scalar_lea.vmem %s641_s6, 128  ;;  %p643_p5 = scmp.lt.s32.totalorder %s914_s26, %s641_s6 }
  0x5a   : > { %p638_p12 = pnand %p636_p6, %p622_p3  ;;  %p644_p10 = scmp.lt.s32.totalorder %s642_s21, %s635_s27 }
  0x5c   : > { %p639_p0 = pneg %p638_p12  ;;  %p645_p13 = por %p644_p10, %p643_p5 }
  0x5e   : > { %p646_p9 = pnand %p645_p13, %p639_p0 }
  0x60   : > { %649 = shalt.err (!%p646_p9)
}
  0x61   : > { %495 = dma.hbm_to_vmem [thread:$0]  (!%p910_p11), %s906_s7, 64, %s914_s26, %s178_s9  }
  0x62   : > { %p1032_p7 = scmp.ne.s32.totalorder %s1027_s24, 0 }
  0x63   : > { %s944_s10 = sand.u32 (!%p1032_p7), 1, %s720_s13   ;;  %p1033_p3 = scmp.ne.s32.totalorder (!%p1032_p7), %s1025_s22, 0 }
  0x64   : > { %197 = sbr.rel (%p1032_p7) target bundleno = 516 (0x204), region = 32  ;;  %s450_s11 = sshll.u32 (!%p1032_p7), %s944_s10, 2 }
  0x65   : > { %s200_s19 = scalar_lea.sflag (!%p1032_p7), [#allocation4], %s944_s10  ;;  %s203_s29 = scalar_lea.vmem (!%p1032_p7), [#allocation3], %s450_s11 }
  0x6b   : > { %703 = dma.done.wait (%p1033_p3), %s200_s19, 64  }
  0x6c   : > { %705 = vsyncadd (%p1033_p3), %s200_s19, 4294967232  ;;  %p1034_p11 = scmp.ne.s32.totalorder %s1023_s20, 0 }
  0x6e   : > { %707 = dma.done.wait (%p1034_p11), [#allocation7], 272  }
  0x6f   : > { %709 = vsyncadd (%p1034_p11), [#allocation7], 4294967024  ;;  %v239_v0 = vld [vmem:[%s203_s29] sm:$0xf]  ;;  %vm242_vm0 = vcmask 261120   ;;  %v560_v4 = vld [vmem:[#allocation8] sm:$0xff]  }
  0x70   : > { %v240_v1 = vunpack.c.l.bf16 %v239_v0  ;;  %v743_v5 = vmov 0.0   ;;  %v561_v6 = vld [vmem:[#allocation8 + $0x8] sm:$0xff]   ;;  %vm744_vm1 = vmmov 0   ;;  %v454_v11 = vld [vmem:[#allocation6] ss:$0 sm:$0xff]  ;;  %vm260_vm2 = vcmask 257024  }
  0x71   : > { %465 = vmatprep.subr.bf16.mxu0 %v743_v5  ;;  %469 = vmatprep.mubr.msk.bf16.mxu0 %vm744_vm1, %v743_v5  ;;  %s459_s20 = sshll.u32 %s728_s15, 6  ;;  %s233_s22 = scalar_lea.vmem [#allocation9], %s450_s11  ;;  %vm324_vm3 = vcmask 781312  }
  0x72   : > { %v241_v2 = vmul.f32 %v240_v1, %v240_v1  ;;  %466 = vmatpush3.bf16.msra.mxu0 %v560_v4  ;;  %s341_s24 = sshll.u32 %s233_s22, 4  ;;  %s966_s8 = scalar_lea.hbm %s1018_s3, %s459_s20  ;;  %s968_s24 = int_to_ptr.vmem [resolvable:$true] %s341_s24 }
  0x73   : > { %467 = vmatprep.subr.bf16.mxu0 %v743_v5  ;;  %s327_s15 = scalar_lea.sflag [#allocation5], %s944_s10  ;;  %s650_s9 = scalar_lea.vmem %s968_s24, 64 }
  0x74   : > { %v243_v3 = vsel %vm242_vm0, %v241_v2, 0.0  ;;  %p651_p1 = scmp.ne.s32.totalorder %s968_s24, %s650_s9  ;;  %s745_s28 = smov [#allocation9]  }
  0x75   : > { %244 = vadd.xlane.f32.xlu0 %v243_v3  ;;  %s654_s30 = sshll.u32 %s745_s28, 4  ;;  %s655_s30 = int_to_ptr.vmem [resolvable:$false] %s654_s30 }
  0x76   : > { %468 = vmatpush3.bf16.msra.mxu0 %v561_v6  ;;  %p652_p4 = pnand %p651_p1, %p892_p8  ;;  %s656_s27 = scalar_lea.vmem %s655_s30, 128 }
  0x77   : > { %p657_p6 = scmp.lt.s32.totalorder %s968_s24, %s655_s30  ;;  %p658_p12 = scmp.lt.s32.totalorder %s656_s27, %s650_s9 }
  0x78   : > { %p653_p2 = pneg %p652_p4 }
  0x79   : > { %p659_p0 = por %p658_p12, %p657_p6 }
  0x7b   : > { %p660_p5 = pnand %p659_p0, %p653_p2 }
 0x102   : > { %v245_v7 = vpop.xlane.xlu0 %244 }
 0x103   : > { %v247_v8 = vmul.f32 0.03125, %v245_v7 }
 0x105   : > { %v248_v9 = vadd.f32 1e-06, %v247_v8 }
 0x107   : > { %562 = vrsqrt.f32 %v248_v9 }
 0x111   : > { %v563_v10 = vpop.eup %562 }
 0x112   : > { %v250_v12 = vmul.f32 %v563_v10, %v240_v1 }
 0x114   : > { %v258_v13 = vmul.f32 %v454_v11, %v250_v12 }
 0x116   : > { %v259_v14 = vpack.c.bf16 %v258_v13, %v258_v13 }
 0x118   : > { %261 = vst.msk [vmem:[#allocation2] sm:$0xf] %vm260_vm2, %v259_v14 }
 0x11f   : > { %v262_v15 = vld [vmem:[#allocation2] sm:$0xf] }
 0x120   : > { %470 = vmatmul.mubr.msk.bf16.vlgmr.msra.gmra.mrb[0].mxu0 %vm242_vm0, %v262_v15 }
 0x1f3   : > { %v317_v16 = vpop.f32.mrb[0].mxu0 }
 0x1f4   : > { %v323_v17 = vpack.c.bf16 %v317_v16, %v317_v16  ;;  %v471_v18 = vpop.f32.mrb[1].mxu0 }
 0x1f5   : > { %v320_v19 = vpop.f32.mrb[2].mxu0 }
 0x1f6   : > { %v472_v20 = vpop.f32.mrb[3].mxu0  ;;  %325 = vst.msk [vmem:[%s233_s22] sm:$0xf] %vm324_vm3, %v323_v17 }
 0x1f7   : > { %663 = shalt.err (!%p660_p5)
}
 0x1f8   : > { %s664_s5 = scalar_lea.hbm %s966_s8, 64  ;;  %s668_s10 = scalar_lea.hbm %s1018_s3, 128 }
 0x1f9   : > { %p665_p10 = scmp.ne.s32.totalorder %s966_s8, %s664_s5  ;;  %p669_p7 = scmp.lt.u32.totalorder %s966_s8, %s1018_s3 }
 0x1fa   : > { %p670_p3 = scmp.lt.u32.totalorder %s668_s10, %s664_s5  ;;  %p672_p1 = scmp.lt.u32.totalorder %s664_s5, %s966_s8 }
 0x1fb   : > { %p666_p13 = pnand %p665_p10, %p892_p8 }
 0x1fc   : > { %p671_p11 = por %p670_p3, %p669_p7 }
 0x1fd   : > { %p667_p9 = pneg %p666_p13 }
 0x1fe   : > { %p673_p4 = por %p672_p1, %p671_p11 }
 0x200   : > { %p674_p2 = pnand %p673_p4, %p667_p9 }
 0x202   : > { %677 = shalt.err (!%p674_p2)
}
 0x203   : > { %483 = dma.vmem_to_hbm [thread:$0]  (%p892_p8), %s968_s24, 64, %s966_s8, %s327_s15  }
 0x204 PF: > { %s353_s29 = sand.u32 1, %s716_s12   ;;  %p1035_p6 = scmp.ne.s32.totalorder %s1026_s23, 0 }
 0x205   : > { %p1036_p12 = scmp.ge.s32.totalorder %s736_s17, 2  ;;  %s354_s20 = scalar_lea.sflag [#allocation5], %s353_s29 }
 0x207   : > { %p497_p0 = pnand %p1036_p12, %p1035_p6 }
 0x209   : > { %711 = dma.done.wait (!%p497_p0), %s354_s20, 64  }
 0x20a   : > { %713 = vsyncadd (!%p497_p0), %s354_s20, 4294967232  ;;  %s20_s17 = sadd.s32 1, %s736_s17   ;;  %s1037_s12 = smov %s720_s13 }
 0x20b   : > { %p17_p5 = scmp.ge.s32.totalorder %s20_s17, 4   ;;  %s1038_s13 = smov %s724_s14 }
 0x20c   : > { %s1039_s14 = smov %s901_s4  ;;  %s1040_s15 = smov %s732_s16 }
 0x20d   : > { %s1041_s16 = smov %s1043_s18  ;;  %19 = sbr.rel (!%p17_p5) target bundleno = 7 (0x7), region = 90 }
 0x214   :  { %359 = vsyncpa [#allocation4], 1 }
 0x215   :  { %361 = vsyncpa [#allocation4 + $0x1], 1 }
 0x216   :  { %362 = vsyncpa [#allocation7], 1 }
 0x217   :  { %363 = vsyncpa [#allocation5], 1 }
 0x218   :  { %365 = vsyncpa [#allocation5 + $0x1], 1 }

// kernel: reward_model_forward.9
= control target key start
LH: loop header
LB: loop body
LE: loop exit
PB: predicated region body
PF: predicated region fallthrough
CT: control target
= control target key end

     0   :  { %10 = vsyncpa [#allocation5], 0  ;;  %s1487_s0 = inlined_call_operand.hbm [shape: bf16[16,32], index: 0, kind: input, shape index: {}]   ;;  %s1488_s1 = inlined_call_operand.hbm [shape: f32[1,32], index: 1, kind: input, shape index: {}]   ;;  %s1489_s2 = inlined_call_operand.hbm [shape: bf16[32,64], index: 2, kind: input, shape index: {}]   ;;  %s1490_s3 = inlined_call_operand.hbm [shape: bf16[32,64], index: 3, kind: input, shape index: {}]   ;;  %s1491_s4 = inlined_call_operand.hbm [shape: bf16[64,32], index: 4, kind: input, shape index: {}]   ;;  %s1492_s5 = inlined_call_operand.hbm [shape: bf16[16,32], index: 5, kind: output, shape index: {}]  }
   0x1   :  { %12 = vsyncpa [#allocation5 + $0x1], 0 }
   0x2   :  { %13 = vsyncpa [#allocation8], 0 }
   0x3   :  { %14 = vsyncpa [#allocation11], 0 }
   0x4   :  { %15 = vsyncpa [#allocation6], 0 }
   0x5   :  { %17 = vsyncpa [#allocation6 + $0x1], 0  ;;  %s1176_s18 = smov 0   ;;  %s1178_s19 = smov 0  }
   0x6   :  { %s1180_s20 = smov 0   ;;  %s1182_s21 = smov 0  }
   0x7   :  { %s1184_s22 = smov 0   ;;  %s1186_s23 = smov 0  }
   0x8 LB: > { %s708_s24 = sadd.s32 4294967295, %s1134_s23   ;;  %p710_p0 = scmp.ge.s32.totalorder %s1134_s23, 1  ;;  %s1134_s23 = sphi %s1186_s23, %s23_s23   ;;  %s1130_s22 = sphi %s1184_s22, %s1516_s22   ;;  %s1126_s21 = sphi %s1182_s21, %s1515_s21   ;;  %s1122_s20 = sphi %s1180_s20, %s1514_s20   ;;  %s1118_s19 = sphi %s1178_s19, %s1513_s19   ;;  %s1114_s18 = sphi %s1176_s18, %s1512_s18  }
   0x9   : > { %p1210_p1 = scmp.eq.s32.totalorder %s708_s24, 0  ;;  %p191_p2 = scmp.lt.s32.totalorder %s1134_s23, 3 }
   0xa   : > { %s1136_s27 = smov [#allocation7]   ;;  %s1137_s30 = smov [#allocation10]  }
   0xb   : > { %s1497_s25 = scalar_select %p1210_p1, 1, 0 }
   0xc   : > { %p1215_p3 = pnand %p710_p0, %p191_p2  ;;  %s204_s28 = sshll.u32 %s1136_s27, 4  ;;  %s205_s28 = int_to_ptr.vmem [resolvable:$true] %s204_s28 }
   0xd   : > { %s231_s6 = sshll.u32 %s1137_s30, 4  ;;  %s1138_s7 = smov [#allocation9]   ;;  %s1228_s6 = int_to_ptr.vmem [resolvable:$true] %s231_s6 }
   0xe   : > { %s1498_s26 = scalar_select %p1215_p3, 1, 0 }
   0xf   : > { %p801_p5 = pneg %p1215_p3  ;;  %s1230_s8 = sshll.u32 %s1138_s7, 4  ;;  %s217_s8 = int_to_ptr.vmem [resolvable:$true] %s1230_s8 }
  0x10   : > { %s902_s11 = scalar_lea.hbm %s1488_s1, 16 }
  0x11   : > { %p1224_p6 = pnand %p801_p5, %p1210_p1  ;;  %p903_p7 = scmp.ne.s32.totalorder %s1488_s1, %s902_s11 }
  0x12   : > { %p909_p11 = scmp.lt.u32.totalorder %s902_s11, %s1488_s1 }
  0x13   : > { %p1240_p8 = pneg %p1224_p6 }
  0x15   : > { %p905_p9 = pnand %p1240_p8, %p903_p7 }
  0x17   : > { %p906_p10 = pneg %p905_p9 }
  0x19   : > { %p911_p12 = pnand %p909_p11, %p906_p10 }
  0x1b   : > { %914 = shalt.err (!%p911_p12)
}
  0x1c   : > { %s915_s17 = scalar_lea.vmem %s205_s28, 16  ;;  %s922_s27 = scalar_lea.vmem %s205_s28, 32 }
  0x1d   : > { %p916_p13 = scmp.ne.s32.totalorder %s205_s28, %s915_s17  ;;  %p923_p5 = scmp.lt.s32.totalorder %s205_s28, %s205_s28 }
  0x1e   : > { %p924_p4 = scmp.lt.s32.totalorder %s922_s27, %s915_s17 }
  0x1f   : > { %p918_p0 = pnand %p916_p13, %p1240_p8 }
  0x20   : > { %p925_p3 = por %p924_p4, %p923_p5 }
  0x21   : > { %p919_p2 = pneg %p918_p0 }
  0x23   : > { %p926_p1 = pnand %p925_p3, %p919_p2 }
  0x25   : > { %929 = shalt.err (!%p926_p1)
}
  0x26   : > { %804 = dma.hbm_to_vmem [thread:$0]  (!%p1224_p6), %s1488_s1, 16, %s205_s28, [#allocation8]  }
  0x27   : > { %s930_s11 = scalar_lea.hbm %s1490_s3, 256 }
  0x28   : > { %p931_p7 = scmp.ne.s32.totalorder %s1490_s3, %s930_s11  ;;  %p937_p1 = scmp.lt.u32.totalorder %s930_s11, %s1490_s3 }
  0x2a   : > { %p933_p9 = pnand %p931_p7, %p1240_p8 }
  0x2c   : > { %p934_p4 = pneg %p933_p9 }
  0x2e   : > { %p939_p3 = pnand %p937_p1, %p934_p4 }
  0x30   : > { %942 = shalt.err (!%p939_p3)
}
  0x31   : > { %s943_s28 = scalar_lea.vmem %s1228_s6, 256  ;;  %p951_p13 = scmp.lt.s32.totalorder %s1228_s6, %s1228_s6 }
  0x32   : > { %p944_p10 = scmp.ne.s32.totalorder %s1228_s6, %s943_s28  ;;  %p952_p0 = scmp.lt.s32.totalorder %s943_s28, %s943_s28 }
  0x34   : > { %p946_p11 = pnand %p944_p10, %p1240_p8  ;;  %p953_p2 = por %p952_p0, %p951_p13 }
  0x36   : > { %p947_p12 = pneg %p946_p11 }
  0x38   : > { %p954_p5 = pnand %p953_p2, %p947_p12 }
  0x3a   : > { %957 = shalt.err (!%p954_p5)
}
  0x3b   : > { %s1139_s17 = smov 64   ;;  %s1140_s27 = smov 4  }
  0x3c   : > { %810 = dma.hbm_to_vmem [thread:$0]  (!%p1224_p6), %s1490_s3, 256, %s1228_s6, [#allocation11], %s1139_s17, %s1139_s17, %s1140_s27  }
  0x3d   : > { %s958_s11 = scalar_lea.hbm %s1489_s2, 256 }
  0x3e   : > { %p959_p7 = scmp.ne.s32.totalorder %s1489_s2, %s958_s11  ;;  %p965_p1 = scmp.lt.u32.totalorder %s958_s11, %s1489_s2 }
  0x40   : > { %p961_p9 = pnand %p959_p7, %p1240_p8 }
  0x42   : > { %p962_p4 = pneg %p961_p9 }
  0x44   : > { %p967_p3 = pnand %p965_p1, %p962_p4 }
  0x46   : > { %970 = shalt.err (!%p967_p3)
}
  0x47   : > { %s971_s28 = scalar_lea.vmem %s217_s8, 256  ;;  %p979_p13 = scmp.lt.s32.totalorder %s217_s8, %s217_s8 }
  0x48   : > { %p972_p10 = scmp.ne.s32.totalorder %s217_s8, %s971_s28  ;;  %p980_p0 = scmp.lt.s32.totalorder %s971_s28, %s971_s28 }
  0x4a   : > { %p974_p11 = pnand %p972_p10, %p1240_p8  ;;  %p981_p2 = por %p980_p0, %p979_p13 }
  0x4c   : > { %p975_p12 = pneg %p974_p11 }
  0x4e   : > { %p982_p5 = pnand %p981_p2, %p975_p12 }
  0x50   : > { %985 = shalt.err (!%p982_p5)
}
  0x51   : > { %807 = dma.hbm_to_vmem [thread:$0]  (!%p1224_p6), %s1489_s2, 256, %s217_s8, [#allocation8], %s1139_s17, %s1139_s17, %s1140_s27  }
  0x52   : > { %s1141_s7 = smov [#allocation12]   ;;  %s986_s12 = scalar_lea.hbm %s1491_s4, 512 }
  0x53   : > { %s247_s9 = sshll.u32 %s1141_s7, 4  ;;  %p987_p7 = scmp.ne.s32.totalorder %s1491_s4, %s986_s12  ;;  %s248_s9 = int_to_ptr.vmem [resolvable:$true] %s247_s9 }
  0x54   : > { %p993_p1 = scmp.lt.u32.totalorder %s986_s12, %s1491_s4 }
  0x55   : > { %p989_p9 = pnand %p987_p7, %p1240_p8 }
  0x57   : > { %p990_p4 = pneg %p989_p9 }
  0x59   : > { %p995_p3 = pnand %p993_p1, %p990_p4 }
  0x5b   : > { %998 = shalt.err (!%p995_p3)
}
  0x5c   : > { %s999_s8 = scalar_lea.vmem %s248_s9, 512  ;;  %p1007_p13 = scmp.lt.s32.totalorder %s248_s9, %s248_s9 }
  0x5d   : > { %p1000_p10 = scmp.ne.s32.totalorder %s248_s9, %s999_s8  ;;  %p1008_p0 = scmp.lt.s32.totalorder %s999_s8, %s999_s8 }
  0x5f   : > { %p1002_p11 = pnand %p1000_p10, %p1240_p8  ;;  %p1009_p2 = por %p1008_p0, %p1007_p13 }
  0x61   : > { %p1003_p12 = pneg %p1002_p11 }
  0x63   : > { %p1010_p5 = pnand %p1009_p2, %p1003_p12 }
  0x65   : > { %1013 = shalt.err (!%p1010_p5)
}
  0x66   : > { %813 = dma.hbm_to_vmem [thread:$0]  (!%p1224_p6), %s1491_s4, 512, %s248_s9, [#allocation11], %s1139_s17, %s1139_s17, %s1140_s27  }
  0x67   : > { %s709_s29 = sadd.s32 4294967294, %s1134_s23   ;;  %s35_s14 = sadd.s32 1, %s1130_s22 }
  0x68   : > { %p37_p8 = scmp.ge.s32.totalorder %s35_s14, 2  ;;  %s42_s7 = sadd.s32 1, %s1122_s20 }
  0x69   : > { %p49_p7 = scmp.ne.s32.totalorder %s1122_s20, %s1118_s19  ;;  %p50_p9 = scmp.eq.s32.totalorder %s1134_s23, 0 }
  0x6a   : > { %s1518_s14 = smov (%p37_p8, %s35_s14), 0  ;;  %p55_p1 = scmp.ne.s32.totalorder %s1118_s19, %s1114_s18 }
  0x6b   : > { %p1333_p4 = por %p50_p9, %p49_p7  ;;  %s39_s17 = ssub.s32 %s1130_s22, %s1518_s14 }
  0x6c   : > { %p178_p6 = scmp.eq.s32.totalorder %s708_s24, 1  ;;  %p40_p3 = scmp.eq.s32.totalorder %s39_s17, 0 }
  0x6d   : > { %p1502_p10 = scmp.ne.s32.totalorder %s1497_s25, 0  ;;  %p184_p13 = scmp.eq.s32.totalorder %s709_s29, 1 }
  0x6e   : > { %p1349_p12 = por %p178_p6, %p49_p7  ;;  %p826_p2 = scmp.lt.s32.totalorder %s1134_s23, 2 }
  0x6f   : > { %p1345_p11 = por %p1502_p10, %p55_p1  ;;  %p1356_p0 = por %p184_p13, %p55_p1 }
  0x70   : > { %s1504_s9 = scalar_select %p1349_p12, 1, 0 }
  0x71   : > { %s1354_s11 = scalar_select %p40_p3, %s1122_s20, %s42_s7  }
  0x72   : > { %s1505_s12 = scalar_select %p1356_p0, 1, 0 }
  0x73   : > { %s261_s13 = sand.u32 1, %s1122_s20   ;;  %s717_s24 = sshll.u32 %s1130_s22, 6 }
  0x74   : > { %s716_s15 = sshll.u32 %s261_s13, 2  ;;  %s1366_s8 = scalar_lea.hbm %s1487_s0, %s717_s24 }
  0x75   : > { %s265_s6 = scalar_lea.vmem [#allocation4], %s716_s15  ;;  %p1370_p5 = pnand %p826_p2, %p1333_p4 }
  0x76   : > { %s272_s30 = sshll.u32 %s265_s6, 4  ;;  %s262_s7 = scalar_lea.sflag [#allocation5], %s261_s13  ;;  %s1374_s30 = int_to_ptr.vmem [resolvable:$true] %s272_s30 }
  0x77   : > { %s1014_s17 = scalar_lea.hbm %s1366_s8, 64  ;;  %p1016_p7 = pneg %p1370_p5 }
  0x78   : > { %p1015_p8 = scmp.ne.s32.totalorder %s1366_s8, %s1014_s17  ;;  %s1019_s10 = scalar_lea.hbm %s1487_s0, 128 }
  0x79   : > { %p1020_p4 = scmp.lt.u32.totalorder %s1366_s8, %s1487_s0  ;;  %p1021_p6 = scmp.lt.u32.totalorder %s1019_s10, %s1014_s17 }
  0x7a   : > { %p1017_p9 = pnand %p1016_p7, %p1015_p8  ;;  %p1023_p10 = scmp.lt.u32.totalorder %s1014_s17, %s1366_s8 }
  0x7b   : > { %p1022_p3 = por %p1021_p6, %p1020_p4 }
  0x7c   : > { %p1018_p1 = pneg %p1017_p9 }
  0x7d   : > { %p1024_p13 = por %p1023_p10, %p1022_p3 }
  0x7f   : > { %p1025_p2 = pnand %p1024_p13, %p1018_p1 }
  0x81   : > { %1028 = shalt.err (!%p1025_p2)
}
  0x82   : > { %s1029_s13 = scalar_lea.vmem %s1374_s30, 64  ;;  %s1142_s6 = smov [#allocation4]  }
  0x83   : > { %p1030_p8 = scmp.ne.s32.totalorder %s1374_s30, %s1029_s13  ;;  %s1034_s24 = sshll.u32 %s1142_s6, 4  ;;  %s1035_s24 = int_to_ptr.vmem [resolvable:$false] %s1034_s24 }
  0x84   : > { %s1036_s15 = scalar_lea.vmem %s1035_s24, 128  ;;  %p1037_p12 = scmp.lt.s32.totalorder %s1374_s30, %s1035_s24 }
  0x85   : > { %p1032_p9 = pnand %p1030_p8, %p1016_p7  ;;  %p1038_p4 = scmp.lt.s32.totalorder %s1036_s15, %s1029_s13 }
  0x87   : > { %p1033_p0 = pneg %p1032_p9  ;;  %p1039_p6 = por %p1038_p4, %p1037_p12 }
  0x89   : > { %p1040_p3 = pnand %p1039_p6, %p1033_p0 }
  0x8b   : > { %1043 = shalt.err (!%p1040_p3)
}
  0x8c   : > { %817 = dma.hbm_to_vmem [thread:$0]  (!%p1370_p5), %s1366_s8, 64, %s1374_s30, %s262_s7  }
  0x8d   : > { %p1507_p1 = scmp.ne.s32.totalorder %s1498_s26, 0 }
  0x8e   : > { %s1404_s17 = sand.u32 (!%p1507_p1), 1, %s1118_s19  }
  0x8f   : > { %281 = sbr.rel (%p1507_p1) target bundleno = 815 (0x32f), region = 40  ;;  %s719_s10 = sshll.u32 (!%p1507_p1), %s1404_s17, 2 }
  0x90   : > { %s284_s16 = scalar_lea.sflag (!%p1507_p1), [#allocation5], %s1404_s17  ;;  %s287_s28 = scalar_lea.vmem (!%p1507_p1), [#allocation4], %s719_s10 }
  0x96   : > { %1097 = dma.done.wait (%p1345_p11), %s284_s16, 64  }
  0x97   : > { %1099 = vsyncadd (%p1345_p11), %s284_s16, 4294967232  ;;  %p1508_p12 = scmp.ne.s32.totalorder %s1497_s25, 0 }
  0x99   : > { %1101 = dma.done.wait (%p1508_p12), [#allocation8], 272  }
  0x9a   : > { %1103 = vsyncadd (%p1508_p12), [#allocation8], 4294967024 }
  0x9b   : > { %1105 = dma.done.wait (%p1508_p12), [#allocation11], 768  }
  0x9c   : > { %1107 = vsyncadd (%p1508_p12), [#allocation11], 4294966528  ;;  %vm339_vm0 = vcmask 261120   ;;  %v1143_v0 = vmov 0.0   ;;  %v336_v1 = vld [vmem:[%s287_s28] sm:$0xf] }
  0x9d   : > { %359 = vst.msk [vmem:[#allocation3] sm:$0xff] %vm339_vm0, %v1143_v0  ;;  %753 = vmatprep.subr.bf16.mxu1 %v1143_v0  ;;  %769 = vmatprep.subr.bf16.mxu0 %v1143_v0  ;;  %v337_v2 = vunpack.c.l.bf16 %v336_v1  ;;  %v888_v5 = vld [vmem:[#allocation9] sm:$0xff]   ;;  %v889_v6 = vld [vmem:[#allocation9 + $0x8] sm:$0xff]   ;;  %vm1144_vm1 = vmmov 0   ;;  %v725_v11 = vld [vmem:[#allocation7] ss:$0 sm:$0xff] }
  0x9e   : > { %754 = vmatpush3.bf16.msra.mxu1 %v888_v5  ;;  %757 = vmatprep.mubr.msk.bf16.mxu1 %vm1144_vm1, %v1143_v0  ;;  %vm357_vm2 = vcmask 257024   ;;  %v890_v15 = vld [vmem:[#allocation10] sm:$0xff]   ;;  %v891_v17 = vld [vmem:[#allocation10 + $0x8] sm:$0xff]   ;;  %v892_v18 = vld [vmem:[#allocation12] sm:$0xff]   ;;  %vm519_vm3 = vcmask 523264   ;;  %s739_s25 = sshll.u32 %s1126_s21, 6 }
  0x9f   : > { %v338_v3 = vmul.f32 %v337_v2, %v337_v2  ;;  %755 = vmatprep.subr.bf16.mxu1 %v1143_v0  ;;  %777 = vmatprep.mubr.msk.bf16.mxu0 %vm1144_vm1, %v1143_v0  ;;  %v893_v19 = vld [vmem:[#allocation12 + $0x8] sm:$0xff]   ;;  %v894_v20 = vld [vmem:[#allocation12 + $0x10] sm:$0xff]   ;;  %v895_v21 = vld [vmem:[#allocation12 + $0x18] sm:$0xff]   ;;  %s329_s26 = scalar_lea.vmem [#allocation13], %s719_s10  ;;  %s1437_s29 = scalar_lea.hbm %s1492_s5, %s739_s25 }
  0xa0   : > { %770 = vmatpush3.bf16.msra.mxu0 %v892_v18  ;;  %s586_s27 = sshll.u32 %s329_s26, 4  ;;  %s573_s7 = scalar_lea.sflag [#allocation6], %s1404_s17  ;;  %s1439_s27 = int_to_ptr.vmem [resolvable:$true] %s586_s27 }
  0xa1   : > { %v340_v4 = vsel %vm339_vm0, %v338_v3, 0.0  ;;  %771 = vmatprep.subr.bf16.mxu0 %v1143_v0  ;;  %s1044_s13 = scalar_lea.vmem %s1439_s27, 64  ;;  %p1509_p0 = scmp.ne.s32.totalorder %s1504_s9, 0 }
  0xa2   : > { %341 = vadd.xlane.f32.xlu0 %v340_v4  ;;  %756 = vmatpush3.bf16.msra.mxu1 %v889_v6  ;;  %p1045_p11 = scmp.ne.s32.totalorder %s1439_s27, %s1044_s13  ;;  %s1145_s21 = smov [#allocation13]  }
  0xa3   : > { %761 = vmatprep.subr.bf16.mxu1 %v1143_v0  ;;  %s1048_s6 = sshll.u32 %s1145_s21, 4  ;;  %s1049_s6 = int_to_ptr.vmem [resolvable:$false] %s1048_s6 }
  0xa4   : > { %772 = vmatpush3.bf16.msra.mxu0 %v893_v19  ;;  %v485_v37 = vld [vmem:[#allocation3] sm:$0xff]  ;;  %p1046_p5 = pnand %p1045_p11, %p1509_p0  ;;  %s1050_s24 = scalar_lea.vmem %s1049_s6, 128 }
  0xa5   : > { %773 = vmatprep.subr.bf16.mxu0 %v1143_v0  ;;  %p1051_p10 = scmp.lt.s32.totalorder %s1439_s27, %s1049_s6  ;;  %p1052_p13 = scmp.lt.s32.totalorder %s1050_s24, %s1044_s13 }
  0xa6   : > { %p1047_p7 = pneg %p1046_p5 }
  0xa7   : > { %p1053_p2 = por %p1052_p13, %p1051_p10 }
  0xa8   : > { %774 = vmatpush3.bf16.msra.mxu0 %v894_v20 }
  0xa9   : > { %775 = vmatprep.subr.bf16.mxu0 %v1143_v0  ;;  %p1054_p8 = pnand %p1053_p2, %p1047_p7 }
  0xac   : > { %776 = vmatpush3.bf16.msra.mxu0 %v895_v21 }
 0x12f   : > { %v342_v7 = vpop.xlane.xlu0 %341 }
 0x130   : > { %v344_v8 = vmul.f32 0.03125, %v342_v7 }
 0x132   : > { %v345_v9 = vadd.f32 1e-06, %v344_v8 }
 0x134   : > { %896 = vrsqrt.f32 %v345_v9 }
 0x13e   : > { %v897_v10 = vpop.eup %896 }
 0x13f   : > { %v347_v12 = vmul.f32 %v897_v10, %v337_v2 }
 0x141   : > { %v355_v13 = vmul.f32 %v725_v11, %v347_v12 }
 0x143   : > { %v356_v14 = vpack.c.bf16 %v355_v13, %v355_v13 }
 0x145   : > { %358 = vst.msk [vmem:[#allocation2] sm:$0xf] %vm357_vm2, %v356_v14 }
 0x14c   : > { %v360_v16 = vld [vmem:[#allocation2] sm:$0xf] }
 0x14d   : > { %758 = vmatmul.mubr.msk.bf16.vlgmr.msra.gmra.mrb[0].mxu1 %vm339_vm0, %v360_v16 }
 0x14e   : > { %762 = vmatpush3.bf16.msra.mxu1 %v890_v15  ;;  %765 = vmatprep.mubr.msk.bf16.mxu1 %vm1144_vm1, %v1143_v0 }
 0x14f   : > { %763 = vmatprep.subr.bf16.mxu1 %v1143_v0 }
 0x152   : > { %764 = vmatpush3.bf16.msra.mxu1 %v891_v17 }
 0x155   : > { %766 = vmatmul.mubr.msk.bf16.vlgmr.msra.gmra.mrb[4].mxu1 %vm339_vm0, %v360_v16 }
 0x220   : > { %v415_v22 = vpop.f32.mrb[0].mxu1 }
 0x221   : > { %v732_v23 = vmul.f32 -1.442695, %v415_v22  ;;  %v759_v24 = vpop.f32.mrb[1].mxu1 }
 0x222   : > { %v418_v25 = vpop.f32.mrb[2].mxu1 }
 0x223   : > { %898 = vpow2.f32 %v732_v23  ;;  %v760_v26 = vpop.f32.mrb[3].mxu1 }
 0x228   : > { %v471_v27 = vpop.f32.mrb[4].mxu1 }
 0x229   : > { %v767_v28 = vpop.f32.mrb[5].mxu1 }
 0x22a   : > { %v474_v29 = vpop.f32.mrb[6].mxu1 }
 0x22b   : > { %v768_v30 = vpop.f32.mrb[7].mxu1 }
 0x22d   : > { %v899_v31 = vpop.eup %898 }
 0x22e   : > { %v480_v32 = vadd.f32 1.0, %v899_v31 }
 0x230   : > { %900 = vrcp.f32 %v480_v32 }
 0x23a   : > { %v901_v33 = vpop.eup %900 }
 0x23b   : > { %v483_v34 = vmul.f32 %v901_v33, %v415_v22 }
 0x23d   : > { %v484_v35 = vmul.f32 %v483_v34, %v471_v27 }
 0x23f   : > { %v486_v36 = vpack.c.bf16 %v484_v35, %v484_v35 }
 0x241   : > { %778 = vmatmul.mubr.msk.bf16.vlgmr.msra.gmra.mrb[0].mxu0 %vm519_vm3, %v486_v36 }
 0x314   : > { %v557_v38 = vpop.f32.mrb[0].mxu0 }
 0x315   : > { %v563_v39 = vadd.f32 %v557_v38, %v485_v37  ;;  %v779_v40 = vpop.f32.mrb[1].mxu0 }
 0x316   : > { %v560_v41 = vpop.f32.mrb[2].mxu0 }
 0x317   : > { %564 = vst.msk [vmem:[#allocation3] sm:$0xff] %vm339_vm0, %v563_v39  ;;  %v780_v42 = vpop.f32.mrb[3].mxu0 }
 0x31e   : > { %v568_v43 = vld [vmem:[#allocation3] sm:$0xff] }
 0x31f   : > { %v569_v44 = vpack.c.bf16 %v568_v43, %v568_v43 }
 0x321   : > { %571 = vst.msk [vmem:[%s329_s26] sm:$0xf] %vm357_vm2, %v569_v44 }
 0x322   : > { %1057 = shalt.err (!%p1054_p8)
}
 0x323   : > { %s1058_s15 = scalar_lea.hbm %s1437_s29, 64  ;;  %s1062_s16 = scalar_lea.hbm %s1492_s5, 128 }
 0x324   : > { %p1059_p9 = scmp.ne.s32.totalorder %s1437_s29, %s1058_s15  ;;  %p1063_p3 = scmp.lt.u32.totalorder %s1437_s29, %s1492_s5 }
 0x325   : > { %p1064_p1 = scmp.lt.u32.totalorder %s1062_s16, %s1058_s15  ;;  %p1066_p11 = scmp.lt.u32.totalorder %s1058_s15, %s1437_s29 }
 0x326   : > { %p1060_p4 = pnand %p1059_p9, %p1509_p0 }
 0x327   : > { %p1065_p12 = por %p1064_p1, %p1063_p3 }
 0x328   : > { %p1061_p6 = pneg %p1060_p4 }
 0x329   : > { %p1067_p5 = por %p1066_p11, %p1065_p12 }
 0x32b   : > { %p1068_p7 = pnand %p1067_p5, %p1061_p6 }
 0x32d   : > { %1071 = shalt.err (!%p1068_p7)
}
 0x32e   : > { %799 = dma.vmem_to_hbm [thread:$0]  (%p1509_p0), %s1439_s27, 64, %s1437_s29, %s573_s7  }
 0x32f PF: > { %s598_s26 = sand.u32 1, %s1114_s18   ;;  %p1510_p10 = scmp.ne.s32.totalorder %s1505_s12, 0 }
 0x330   : > { %p1511_p13 = scmp.ge.s32.totalorder %s1134_s23, 2  ;;  %s599_s8 = scalar_lea.sflag [#allocation6], %s598_s26 }
 0x332   : > { %p819_p2 = pnand %p1511_p13, %p1510_p10 }
 0x334   : > { %1109 = dma.done.wait (!%p819_p2), %s599_s8, 64  }
 0x335   : > { %1111 = vsyncadd (!%p819_p2), %s599_s8, 4294967232  ;;  %s23_s23 = sadd.s32 1, %s1134_s23   ;;  %s1512_s18 = smov %s1118_s19 }
 0x336   : > { %p20_p8 = scmp.ge.s32.totalorder %s23_s23, 4   ;;  %s1513_s19 = smov %s1122_s20 }
 0x337   : > { %s1514_s20 = smov %s1354_s11  ;;  %s1515_s21 = smov %s1130_s22 }
 0x338   : > { %s1516_s22 = smov %s1518_s14  ;;  %22 = sbr.rel (!%p20_p8) target bundleno = 8 (0x8), region = 112 }
 0x33f   :  { %604 = vsyncpa [#allocation5], 1 }
 0x340   :  { %606 = vsyncpa [#allocation5 + $0x1], 1 }
 0x341   :  { %607 = vsyncpa [#allocation8], 1 }
 0x342   :  { %608 = vsyncpa [#allocation11], 1 }
 0x343   :  { %609 = vsyncpa [#allocation6], 1 }
 0x344   :  { %611 = vsyncpa [#allocation6 + $0x1], 1 }

// kernel: reward_model_forward.13
= control target key start
LH: loop header
LB: loop body
LE: loop exit
PB: predicated region body
PF: predicated region fallthrough
CT: control target
= control target key end

     0   :  { %14 = vsyncpa [#allocation6], 0  ;;  %s848_s0 = inlined_call_operand.hbm [shape: bf16[2,32], index: 0, kind: input, shape index: {}]   ;;  %s849_s1 = inlined_call_operand.hbm [shape: f32[1,32], index: 1, kind: input, shape index: {}]   ;;  %s850_s2 = inlined_call_operand.hbm [shape: bf16[32,64], index: 2, kind: input, shape index: {}]   ;;  %s851_s3 = inlined_call_operand.hbm [shape: bf16[32,64], index: 3, kind: input, shape index: {}]   ;;  %s852_s4 = inlined_call_operand.hbm [shape: bf16[64,32], index: 4, kind: input, shape index: {}]   ;;  %s853_s5 = inlined_call_operand.hbm [shape: f32[1,32], index: 5, kind: input, shape index: {}]   ;;  %s854_s6 = inlined_call_operand.hbm [shape: f32[1,32], index: 6, kind: input, shape index: {}]   ;;  %s855_s7 = inlined_call_operand.<no memory space> [shape: f32[1], index: 7, kind: input, shape index: {}]   ;;  %s856_s8 = inlined_call_operand.hbm [shape: f32[2,128], index: 8, kind: output, shape index: {}]  }
   0x1   :  { %15 = vsyncpa [#allocation9], 0 }
   0x2   :  { %16 = vsyncpa [#allocation12], 0 }
   0x3   :  { %17 = vsyncpa [#allocation15], 0 }
   0x4   :  { %18 = vsyncpa [#allocation7], 0  ;;  %s675_s27 = smov [#allocation8]   ;;  %s489_s9 = scalar_lea.hbm %s849_s1, 16 }
   0x5   :  { %s35_s28 = sshll.u32 %s675_s27, 4  ;;  %p490_p0 = scmp.ne.s32.totalorder %s849_s1, %s489_s9  ;;  %s36_s28 = int_to_ptr.vmem [resolvable:$true] %s35_s28 }
   0x6   :  { %p493_p1 = scmp.lt.u32.totalorder %s489_s9, %s849_s1 }
   0x8   :  { %p495_p2 = pnand %p493_p1, %p490_p0 }
   0xa   :  { %498 = shalt.err (!%p495_p2)
}
   0xb   :  { %s499_s14 = scalar_lea.vmem %s36_s28, 16  ;;  %s503_s15 = scalar_lea.vmem %s36_s28, 32 }
   0xc   :  { %p500_p3 = scmp.ne.s32.totalorder %s36_s28, %s499_s14  ;;  %p504_p4 = scmp.lt.s32.totalorder %s36_s28, %s36_s28 }
   0xd   :  { %p505_p5 = scmp.lt.s32.totalorder %s503_s15, %s499_s14 }
   0xf   :  { %p506_p6 = por %p505_p5, %p504_p4 }
  0x11   :  { %p507_p7 = pnand %p506_p6, %p500_p3 }
  0x13   :  { %510 = shalt.err (!%p507_p7)
}
  0x14   :  { %38 = dma.hbm_to_vmem [thread:$0]  %s849_s1, 16, %s36_s28, [#allocation9]  }
  0x15   :  { %s676_s18 = smov [#allocation11]   ;;  %s677_s20 = smov [#allocation14]  }
  0x16   :  { %s56_s19 = sshll.u32 %s676_s18, 4  ;;  %s81_s21 = sshll.u32 %s677_s20, 4  ;;  %s57_s19 = int_to_ptr.vmem [resolvable:$true] %s56_s19  ;;  %s82_s21 = int_to_ptr.vmem [resolvable:$true] %s81_s21 }
  0x17   :  { %s511_s24 = scalar_lea.hbm %s851_s3, 256 }
  0x18   :  { %p512_p8 = scmp.ne.s32.totalorder %s851_s3, %s511_s24  ;;  %p515_p9 = scmp.lt.u32.totalorder %s511_s24, %s851_s3 }
  0x1a   :  { %p517_p10 = pnand %p515_p9, %p512_p8 }
  0x1c   :  { %520 = shalt.err (!%p517_p10)
}
  0x1d   :  { %s521_s1 = scalar_lea.vmem %s57_s19, 256  ;;  %p526_p12 = scmp.lt.s32.totalorder %s57_s19, %s57_s19 }
  0x1e   :  { %p522_p11 = scmp.ne.s32.totalorder %s57_s19, %s521_s1  ;;  %p527_p13 = scmp.lt.s32.totalorder %s521_s1, %s521_s1 }
  0x20   :  { %p528_p0 = por %p527_p13, %p526_p12 }
  0x22   :  { %p529_p1 = pnand %p528_p0, %p522_p11 }
  0x24   :  { %532 = shalt.err (!%p529_p1)
}
  0x25   :  { %s678_s28 = smov 64   ;;  %s679_s30 = smov 4  }
  0x26   :  { %62 = dma.hbm_to_vmem [thread:$0]  %s851_s3, 256, %s57_s19, [#allocation12], %s678_s28, %s678_s28, %s679_s30  }
  0x27   :  { %s533_s13 = scalar_lea.hbm %s853_s5, 16 }
  0x28   :  { %p534_p2 = scmp.ne.s32.totalorder %s853_s5, %s533_s13  ;;  %p537_p3 = scmp.lt.u32.totalorder %s533_s13, %s853_s5 }
  0x2a   :  { %p539_p4 = pnand %p537_p3, %p534_p2 }
  0x2c   :  { %542 = shalt.err (!%p539_p4)
}
  0x2d   :  { %s543_s18 = scalar_lea.vmem %s82_s21, 16  ;;  %s547_s20 = scalar_lea.vmem %s82_s21, 32 }
  0x2e   :  { %p544_p5 = scmp.ne.s32.totalorder %s82_s21, %s543_s18  ;;  %p548_p6 = scmp.lt.s32.totalorder %s82_s21, %s82_s21 }
  0x2f   :  { %p549_p7 = scmp.lt.s32.totalorder %s547_s20, %s543_s18 }
  0x31   :  { %p550_p8 = por %p549_p7, %p548_p6 }
  0x33   :  { %p551_p9 = pnand %p550_p8, %p544_p5 }
  0x35   :  { %554 = shalt.err (!%p551_p9)
}
  0x36   :  { %84 = dma.hbm_to_vmem [thread:$0]  %s853_s5, 16, %s82_s21, [#allocation15]  }
  0x37   :  { %s680_s22 = smov [#allocation5]   ;;  %s681_s24 = smov [#allocation10]  }
  0x38   :  { %s25_s23 = sshll.u32 %s680_s22, 4  ;;  %s44_s25 = sshll.u32 %s681_s24, 4  ;;  %s26_s23 = int_to_ptr.vmem [resolvable:$true] %s25_s23  ;;  %s45_s25 = int_to_ptr.vmem [resolvable:$true] %s44_s25 }
  0x39   :  { %s555_s29 = scalar_lea.hbm %s848_s0, 16 }
  0x3a   :  { %p556_p10 = scmp.ne.s32.totalorder %s848_s0, %s555_s29  ;;  %p559_p11 = scmp.lt.u32.totalorder %s555_s29, %s848_s0 }
  0x3c   :  { %p561_p12 = pnand %p559_p11, %p556_p10 }
  0x3e   :  { %564 = shalt.err (!%p561_p12)
}
  0x3f   :  { %s565_s5 = scalar_lea.vmem %s26_s23, 16  ;;  %s569_s21 = scalar_lea.vmem %s26_s23, 32 }
  0x40   :  { %p566_p13 = scmp.ne.s32.totalorder %s26_s23, %s565_s5  ;;  %p570_p0 = scmp.lt.s32.totalorder %s26_s23, %s26_s23 }
  0x41   :  { %p571_p1 = scmp.lt.s32.totalorder %s569_s21, %s565_s5 }
  0x43   :  { %p572_p2 = por %p571_p1, %p570_p0 }
  0x45   :  { %p573_p3 = pnand %p572_p2, %p566_p13 }
  0x47   :  { %576 = shalt.err (!%p573_p3)
}
  0x48   :  { %28 = dma.hbm_to_vmem [thread:$0]  %s848_s0, 16, %s26_s23, [#allocation6]  }
  0x49   :  { %s577_s16 = scalar_lea.hbm %s850_s2, 256 }
  0x4a   :  { %p578_p4 = scmp.ne.s32.totalorder %s850_s2, %s577_s16  ;;  %p581_p5 = scmp.lt.u32.totalorder %s577_s16, %s850_s2 }
  0x4c   :  { %p583_p6 = pnand %p581_p5, %p578_p4 }
  0x4e   :  { %586 = shalt.err (!%p583_p6)
}
  0x4f   :  { %s587_s19 = scalar_lea.vmem %s45_s25, 256  ;;  %p592_p8 = scmp.lt.s32.totalorder %s45_s25, %s45_s25 }
  0x50   :  { %p588_p7 = scmp.ne.s32.totalorder %s45_s25, %s587_s19  ;;  %p593_p9 = scmp.lt.s32.totalorder %s587_s19, %s587_s19 }
  0x52   :  { %p594_p10 = por %p593_p9, %p592_p8 }
  0x54   :  { %p595_p11 = pnand %p594_p10, %p588_p7 }
  0x56   :  { %598 = shalt.err (!%p595_p11)
}
  0x57   :  { %50 = dma.hbm_to_vmem [thread:$0]  %s850_s2, 256, %s45_s25, [#allocation9], %s678_s28, %s678_s28, %s679_s30  }
  0x58   :  { %s682_s23 = smov [#allocation13]   ;;  %s683_s26 = smov [#allocation16]  }
  0x59   :  { %s68_s24 = sshll.u32 %s682_s23, 4  ;;  %s91_s27 = sshll.u32 %s683_s26, 4  ;;  %s69_s24 = int_to_ptr.vmem [resolvable:$true] %s68_s24  ;;  %s92_s27 = int_to_ptr.vmem [resolvable:$true] %s91_s27 }
  0x5a   :  { %s599_s9 = scalar_lea.hbm %s852_s4, 512 }
  0x5b   :  { %p600_p12 = scmp.ne.s32.totalorder %s852_s4, %s599_s9  ;;  %p603_p13 = scmp.lt.u32.totalorder %s599_s9, %s852_s4 }
  0x5d   :  { %p605_p0 = pnand %p603_p13, %p600_p12 }
  0x5f   :  { %608 = shalt.err (!%p605_p0)
}
  0x60   :  { %s609_s2 = scalar_lea.vmem %s69_s24, 512  ;;  %p614_p2 = scmp.lt.s32.totalorder %s69_s24, %s69_s24 }
  0x61   :  { %p610_p1 = scmp.ne.s32.totalorder %s69_s24, %s609_s2  ;;  %p615_p3 = scmp.lt.s32.totalorder %s609_s2, %s609_s2 }
  0x63   :  { %p616_p4 = por %p615_p3, %p614_p2 }
  0x65   :  { %p617_p5 = pnand %p616_p4, %p610_p1 }
  0x67   :  { %620 = shalt.err (!%p617_p5)
}
  0x68   :  { %74 = dma.hbm_to_vmem [thread:$0]  %s852_s4, 512, %s69_s24, [#allocation12], %s678_s28, %s678_s28, %s679_s30  }
  0x69   :  { %s621_s15 = scalar_lea.hbm %s854_s6, 16 }
  0x6a   :  { %p622_p6 = scmp.ne.s32.totalorder %s854_s6, %s621_s15  ;;  %p625_p7 = scmp.lt.u32.totalorder %s621_s15, %s854_s6 }
  0x6c   :  { %p627_p8 = pnand %p625_p7, %p622_p6 }
  0x6e   :  { %630 = shalt.err (!%p627_p8)
}
  0x6f   :  { %s631_s3 = scalar_lea.vmem %s92_s27, 16  ;;  %s635_s19 = scalar_lea.vmem %s92_s27, 32 }
  0x70   :  { %p632_p9 = scmp.ne.s32.totalorder %s92_s27, %s631_s3  ;;  %p636_p10 = scmp.lt.s32.totalorder %s92_s27, %s92_s27 }
  0x71   :  { %p637_p11 = scmp.lt.s32.totalorder %s635_s19, %s631_s3 }
  0x73   :  { %p638_p12 = por %p637_p11, %p636_p10 }
  0x75   :  { %p639_p13 = pnand %p638_p12, %p632_p9 }
  0x77   :  { %642 = shalt.err (!%p639_p13)
}
  0x78   :  { %94 = dma.hbm_to_vmem [thread:$0]  %s854_s6, 16, %s92_s27, [#allocation15]  }
  0x79   :  { %665 = dma.done.wait [#allocation6], 16  }
  0x7a   :  { %666 = vsyncadd [#allocation6], 4294967280 }
  0x7b   :  { %667 = dma.done.wait [#allocation9], 272  }
  0x7c   :  { %668 = vsyncadd [#allocation9], 4294967024 }
  0x7d   :  { %669 = dma.done.wait [#allocation12], 768  }
  0x7e   :  { %670 = vsyncadd [#allocation12], 4294966528 }
  0x7f   :  { %671 = dma.done.wait [#allocation15], 32  }
  0x80   :  { %672 = vsyncadd [#allocation15], 4294967264  ;;  %vm126_vm0 = vcmask 254976   ;;  %v684_v0 = vmov 0.0   ;;  %v123_v1 = vld [vmem:[#allocation5] sm:$0x1]  ;;  %v386_v56 = vstv %s855_s7 }
  0x81   :  { %146 = vst.msk [vmem:[#allocation3] sm:$0x3] %vm126_vm0, %v684_v0  ;;  %433 = vmatprep.subr.bf16.mxu1 %v684_v0  ;;  %449 = vmatprep.subr.bf16.mxu0 %v684_v0  ;;  %v124_v2 = vunpack.c.l.bf16 %v123_v1  ;;  %v473_v5 = vld [vmem:[#allocation10] sm:$0xff]   ;;  %v474_v6 = vld [vmem:[#allocation10 + $0x8] sm:$0xff]   ;;  %vm685_vm1 = vmmov 0   ;;  %vm144_vm2 = vcmask 253952  }
  0x82   :  { %434 = vmatpush3.bf16.msra.mxu1 %v473_v5  ;;  %437 = vmatprep.mubr.msk.bf16.mxu1 %vm685_vm1, %v684_v0  ;;  %v407_v11 = vld [vmem:[#allocation8] ss:$0 sm:$0xff]  ;;  %vm164_vm3 = vcmask 261120   ;;  %v475_v15 = vld [vmem:[#allocation11] sm:$0xff]   ;;  %v477_v18 = vld [vmem:[#allocation13] sm:$0xff]   ;;  %vm306_vm4 = vcmask 523264  }
  0x83   :  { %v125_v3 = vmul.f32 %v124_v2, %v124_v2  ;;  %435 = vmatprep.subr.bf16.mxu1 %v684_v0  ;;  %457 = vmatprep.mubr.msk.bf16.mxu0 %vm685_vm1, %v684_v0  ;;  %v476_v17 = vld [vmem:[#allocation11 + $0x8] sm:$0xff]   ;;  %v478_v19 = vld [vmem:[#allocation13 + $0x8] sm:$0xff]   ;;  %v479_v20 = vld [vmem:[#allocation13 + $0x10] sm:$0xff]   ;;  %s686_s0 = smov [#allocation17]  }
  0x84   :  { %450 = vmatpush3.bf16.msra.mxu0 %v477_v18  ;;  %v480_v21 = vld [vmem:[#allocation13 + $0x18] sm:$0xff]   ;;  %v420_v50 = vld [vmem:[#allocation14] ss:$0 sm:$0xff]  ;;  %v421_v52 = vld [vmem:[#allocation16] ss:$0 sm:$0xff]  ;;  %s395_s22 = sshll.u32 %s686_s0, 4  ;;  %s396_s22 = int_to_ptr.vmem [resolvable:$true] %s395_s22 }
  0x85   :  { %v127_v4 = vsel %vm126_vm0, %v125_v3, 0.0  ;;  %451 = vmatprep.subr.bf16.mxu0 %v684_v0  ;;  %s643_s23 = scalar_lea.vmem %s396_s22, 32  ;;  %p648_p1 = scmp.lt.s32.totalorder %s396_s22, %s396_s22 }
  0x86   :  { %128 = vadd.xlane.f32.xlu0 %v127_v4  ;;  %436 = vmatpush3.bf16.msra.mxu1 %v474_v6  ;;  %p644_p0 = scmp.ne.s32.totalorder %s396_s22, %s643_s23  ;;  %p649_p2 = scmp.lt.s32.totalorder %s643_s23, %s643_s23 }
  0x87   :  { %441 = vmatprep.subr.bf16.mxu1 %v684_v0 }
  0x88   :  { %452 = vmatpush3.bf16.msra.mxu0 %v478_v19  ;;  %v272_v37 = vld [vmem:[#allocation3] sm:$0x3]  ;;  %p650_p3 = por %p649_p2, %p648_p1 }
  0x89   :  { %453 = vmatprep.subr.bf16.mxu0 %v684_v0 }
  0x8a   :  { %p651_p4 = pnand %p650_p3, %p644_p0 }
  0x8c   :  { %454 = vmatpush3.bf16.msra.mxu0 %v479_v20 }
  0x8d   :  { %455 = vmatprep.subr.bf16.mxu0 %v684_v0 }
  0x90   :  { %456 = vmatpush3.bf16.msra.mxu0 %v480_v21 }
 0x113   :  { %v129_v7 = vpop.xlane.xlu0 %128 }
 0x114   :  { %v131_v8 = vmul.f32 0.03125, %v129_v7 }
 0x116   :  { %v132_v9 = vadd.f32 1e-06, %v131_v8 }
 0x118   :  { %481 = vrsqrt.f32 %v132_v9 }
 0x122   :  { %v482_v10 = vpop.eup %481 }
 0x123   :  { %v134_v12 = vmul.f32 %v482_v10, %v124_v2 }
 0x125   :  { %v142_v13 = vmul.f32 %v407_v11, %v134_v12 }
 0x127   :  { %v143_v14 = vpack.c.bf16 %v142_v13, %v142_v13 }
 0x129   :  { %145 = vst.msk [vmem:[#allocation2] sm:$0x1] %vm144_vm2, %v143_v14 }
 0x130   :  { %v147_v16 = vld [vmem:[#allocation2] sm:$0x1] }
 0x131   :  { %438 = vmatmul.mubr.msk.bf16.vlgmr.msra.gmra.mrb[0].mxu1 %vm164_vm3, %v147_v16 }
 0x132   :  { %442 = vmatpush3.bf16.msra.mxu1 %v475_v15  ;;  %445 = vmatprep.mubr.msk.bf16.mxu1 %vm685_vm1, %v684_v0 }
 0x133   :  { %443 = vmatprep.subr.bf16.mxu1 %v684_v0 }
 0x136   :  { %444 = vmatpush3.bf16.msra.mxu1 %v476_v17 }
 0x139   :  { %446 = vmatmul.mubr.msk.bf16.vlgmr.msra.gmra.mrb[4].mxu1 %vm164_vm3, %v147_v16 }
 0x204   :  { %v202_v22 = vpop.f32.mrb[0].mxu1 }
 0x205   :  { %v414_v23 = vmul.f32 -1.442695, %v202_v22  ;;  %v439_v24 = vpop.f32.mrb[1].mxu1 }
 0x206   :  { %v205_v25 = vpop.f32.mrb[2].mxu1 }
 0x207   :  { %483 = vpow2.f32 %v414_v23  ;;  %v440_v26 = vpop.f32.mrb[3].mxu1 }
 0x20c   :  { %v258_v27 = vpop.f32.mrb[4].mxu1 }
 0x20d   :  { %v447_v28 = vpop.f32.mrb[5].mxu1 }
 0x20e   :  { %v261_v29 = vpop.f32.mrb[6].mxu1 }
 0x20f   :  { %v448_v30 = vpop.f32.mrb[7].mxu1 }
 0x211   :  { %v484_v31 = vpop.eup %483 }
 0x212   :  { %v267_v32 = vadd.f32 1.0, %v484_v31 }
 0x214   :  { %485 = vrcp.f32 %v267_v32 }
 0x21e   :  { %v486_v33 = vpop.eup %485 }
 0x21f   :  { %v270_v34 = vmul.f32 %v486_v33, %v202_v22 }
 0x221   :  { %v271_v35 = vmul.f32 %v270_v34, %v258_v27 }
 0x223   :  { %v273_v36 = vpack.c.bf16 %v271_v35, %v271_v35 }
 0x225   :  { %458 = vmatmul.mubr.msk.bf16.vlgmr.msra.gmra.mrb[0].mxu0 %vm306_vm4, %v273_v36 }
 0x2f8   :  { %v344_v38 = vpop.f32.mrb[0].mxu0 }
 0x2f9   :  { %v350_v39 = vadd.f32 %v344_v38, %v272_v37  ;;  %v459_v40 = vpop.f32.mrb[1].mxu0 }
 0x2fa   :  { %v347_v41 = vpop.f32.mrb[2].mxu0 }
 0x2fb   :  { %352 = vst.msk [vmem:[#allocation3] sm:$0x3] %vm126_vm0, %v350_v39  ;;  %v460_v42 = vpop.f32.mrb[3].mxu0 }
 0x302   :  { %v356_v43 = vld [vmem:[#allocation3] sm:$0x3] }
 0x303   :  { %v357_v44 = vmul.f32 %v356_v43, %v356_v43 }
 0x305   :  { %v358_v45 = vsel %vm126_vm0, %v357_v44, 0.0 }
 0x306   :  { %359 = vadd.xlane.f32.xlu0 %v358_v45 }
 0x393   :  { %v360_v46 = vpop.xlane.xlu0 %359 }
 0x394   :  { %v362_v47 = vmul.f32 0.03125, %v360_v46 }
 0x396   :  { %v363_v48 = vadd.f32 1e-06, %v362_v47 }
 0x398   :  { %487 = vrsqrt.f32 %v363_v48 }
 0x3a2   :  { %v488_v49 = vpop.eup %487 }
 0x3a3   :  { %v365_v51 = vmul.f32 %v488_v49, %v356_v43 }
 0x3a5   :  { %v373_v53 = vmul.f32 %v420_v50, %v365_v51 }
 0x3a7   :  { %v381_v54 = vmul.f32 %v421_v52, %v373_v53 }
 0x3a9   :  { %v382_v55 = vsel %vm126_vm0, %v381_v54, 0.0 }
 0x3aa   :  { %383 = vadd.xlane.f32.xlu1 %v382_v55 }
 0x437   :  { %v384_v57 = vpop.xlane.xlu1 %383 }
 0x438   :  { %v387_v58 = vadd.f32 %v386_v56, %v384_v57 }
 0x43a   :  { %388 = vst [vmem:[#allocation17] sm:$0x3] %v387_v58 }
 0x43b   :  { %654 = shalt.err (!%p651_p4)
}
 0x43c   :  { %s655_s27 = scalar_lea.hbm %s856_s8, 32 }
 0x43d   :  { %p656_p5 = scmp.ne.s32.totalorder %s856_s8, %s655_s27  ;;  %p659_p6 = scmp.lt.u32.totalorder %s655_s27, %s856_s8 }
 0x43f   :  { %p661_p7 = pnand %p659_p6, %p656_p5 }
 0x441   :  { %664 = shalt.err (!%p661_p7)
}
 0x442   :  { %398 = dma.vmem_to_hbm [thread:$0]  %s396_s22, 32, %s856_s8, [#allocation7]  }
 0x443   :  { %673 = dma.done.wait [#allocation7], 32  }
 0x444   :  { %674 = vsyncadd [#allocation7], 4294967264 }
 0x445   :  { %402 = vsyncpa [#allocation6], 1 }
 0x446   :  { %403 = vsyncpa [#allocation9], 1 }
 0x447   :  { %404 = vsyncpa [#allocation12], 1 }
 0x448   :  { %405 = vsyncpa [#allocation15], 1 }
 0x449   :  { %406 = vsyncpa [#allocation7], 1 }

</bundles_post_ra>
